<compile_context>
chip_gen: v5e
topology: v5e:2x2
jax: 0.10.0
libtpu: 0.0.40
codegen_flags: <defaults>
</compile_context>

<pallas_src>
import functools
import math

import jax
import jax.numpy as jnp
from jax import lax
from jax.experimental import pallas as pl
from jax.experimental.pallas import tpu as pltpu

# ----------------------------- config (small) -------------------------------
VOCAB = 256          # stands in for 21128
HIDDEN = 32
NUM_HEADS = 2
HEAD_DIM = HIDDEN // NUM_HEADS
NUM_LAYERS = 2
INTERMEDIATE = 64
MAX_POS = 16
TYPE_VOCAB = 2
NUM_CLASSES = 3
BATCH = 2
SEQ = 8
LN_EPS = 1e-12

HP = 128                       # padded hidden (32 -> 128)
IP = 128                       # padded intermediate (64 -> 128)
VP = VOCAB                     # 256, already lane-aligned
CP = 128                       # padded num-classes (3 -> 128)


# ----------------------------- padding helpers ------------------------------
def _pad2(a, rows, cols):
    r, c = a.shape
    return jnp.pad(a, ((0, rows - r), (0, cols - c)))


# ----------------------------- in-kernel helpers ----------------------------
def _mm(x, w):
    """bf16 MXU matmul with f32 accumulation (w already stored bf16)."""
    return jnp.dot(x.astype(jnp.bfloat16), w,
                   preferred_element_type=jnp.float32)


def _ln(x, g, b, inv_n):
    """LayerNorm over the real feature lanes.

    Padded lanes of x are zero by construction (zero-padded weights / biases /
    gamma / beta keep them zero through every op), so no lane mask is needed:
    sums over all 128 lanes equal sums over the real `hidden` lanes, and the
    zero-padded gamma/beta re-zero the padded output lanes.
    """
    mu = jnp.sum(x, axis=-1, keepdims=True) * inv_n
    var = jnp.sum(x * x, axis=-1, keepdims=True) * inv_n - mu * mu
    inv = lax.rsqrt(jnp.maximum(var, 0.0) + LN_EPS)
    return (x - mu) * inv * g + b


# ----------------------------- the fused kernel -----------------------------
def _bert_kernel(x_ref, emb_g_ref, emb_b_ref, am_ref,
                 wqkv_ref, bqkv_ref, wo_ref, bo_ref, ln1g_ref, ln1b_ref,
                 wf1_ref, bf1_ref, wf2_ref, bf2_ref, ln2g_ref, ln2b_ref,
                 mlm_w_ref, mlm_b_ref, mlm_g_ref, mlm_beta_ref,
                 dec_w_ref, dec_b_ref, pre_w_ref, pre_b_ref,
                 cls_w_ref, cls_b_ref,
                 o_ref, h_ref,
                 *, seq, num_heads, head_dim, hidden):
    """grid = (batch, layer). One sequence per step; h carried in VMEM scratch."""
    layer = pl.program_id(1)
    inv_n = 1.0 / hidden

    # ---- layer 0: embedding LayerNorm (initialise the resident hidden state)
    @pl.when(layer == 0)
    def _():
        h_ref[...] = _ln(x_ref[...], emb_g_ref[...], emb_b_ref[...], inv_n)

    x = h_ref[...]                                        # (S, HP) f32

    # Per-head lane masks generated in-kernel (no constant-mask inputs).
    lane = lax.broadcasted_iota(jnp.int32, (1, HP), 1)
    head_masks = [((lane >= h * head_dim) & (lane < (h + 1) * head_dim))
                  .astype(jnp.float32) for h in range(num_heads)]

    # ---- fused QKV projection (scale 1/sqrt(d) pre-folded into Wq at init).
    qkv = _mm(x, wqkv_ref[...]) + bqkv_ref[...]           # (S, 3*HP) f32
    q = qkv[:, 0:HP]
    k = qkv[:, HP:2 * HP].astype(jnp.bfloat16)
    v = qkv[:, 2 * HP:3 * HP].astype(jnp.bfloat16)

    # ---- attention, batched over heads:
    # stack lane-masked Q for every head along rows -> ONE score matmul,
    # ONE softmax over the stack, ONE PV matmul, then fold head row-blocks
    # back into their disjoint lane ranges (== concat-heads layout).
    q_stack = jnp.concatenate([q * hm for hm in head_masks],
                              axis=0).astype(jnp.bfloat16)          # (H*S, HP)
    s = lax.dot_general(q_stack, k, (((1,), (1,)), ((), ())),
                        preferred_element_type=jnp.float32)         # (H*S, S)
    s = s + am_ref[...]                                             # (1, S)
    s = s - jnp.max(s, axis=-1, keepdims=True)
    p = jnp.exp(s)
    p = p * pl.reciprocal(jnp.sum(p, axis=-1, keepdims=True), approx=True)
    ctx_stack = jnp.dot(p.astype(jnp.bfloat16), v,
                        preferred_element_type=jnp.float32)         # (H*S, HP)
    ctx = ctx_stack[0:seq, :] * head_masks[0]
    for h in range(1, num_heads):
        ctx = ctx + ctx_stack[h * seq:(h + 1) * seq, :] * head_masks[h]

    # ---- attention out-proj + residual + LN1.
    attn_out = _mm(ctx, wo_ref[...]) + bo_ref[...]
    h1 = _ln(attn_out + x, ln1g_ref[...], ln1b_ref[...], inv_n)

    # ---- FFN + residual + LN2.
    ff = jax.nn.gelu(_mm(h1, wf1_ref[...]) + bf1_ref[...], approximate=True)
    ff2 = _mm(ff, wf2_ref[...]) + bf2_ref[...]
    h_new = _ln(ff2 + h1, ln2g_ref[...], ln2b_ref[...], inv_n)
    h_ref[...] = h_new

    # ---- last layer: classification head on the CLS row only.
    # (The PyTorch forward only consumes hidden_state[:, 0].)
    @pl.when(layer == pl.num_programs(1) - 1)
    def _():
        cls = h_new[0:1, :]                                          # (1, HP)
        # MLM transform (dense -> gelu -> LN) + decoder to vocab.
        t = jax.nn.gelu(_mm(cls, mlm_w_ref[...]) + mlm_b_ref[...],
                        approximate=True)
        t = _ln(t, mlm_g_ref[...], mlm_beta_ref[...], inv_n)
        logits = _mm(t, dec_w_ref[...]) + dec_b_ref[...]             # (1, VP)
        # pre_classifier + ReLU (+ dropout = identity in eval) + classifier.
        pooler = jnp.maximum(_mm(logits, pre_w_ref[...]) + pre_b_ref[...], 0.0)
        o_ref[...] = _mm(pooler, cls_w_ref[...]) + cls_b_ref[...]    # (1, CP)


# ----------------------------- parameters -----------------------------------
def init_params(key):
    keys = iter(jax.random.split(key, 64))

    def nrm(shape, scale=0.02):
        return scale * jax.random.normal(next(keys), shape, dtype=jnp.float32)

    def padw(a, rows, cols):
        return _pad2(a, rows, cols).astype(jnp.bfloat16)

    def ln_gamma(n, npad):
        return jnp.pad(jnp.ones((n,), jnp.float32), (0, npad - n)).reshape(1, npad)

    def zero_bias(npad):
        return jnp.zeros((1, npad), jnp.float32)

    att_scale = 1.0 / math.sqrt(HEAD_DIM)

    wqkv, bqkv, wo, bo, ln1g, ln1b = [], [], [], [], [], []
    wf1, bf1, wf2, bf2, ln2g, ln2b = [], [], [], [], [], []
    for _ in range(NUM_LAYERS):
        # Fold the softmax scale into Wq (and the q bias, zero here) at init.
        q_w = _pad2(nrm((HIDDEN, HIDDEN)) * att_scale, HP, HP)
        k_w = _pad2(nrm((HIDDEN, HIDDEN)), HP, HP)
        v_w = _pad2(nrm((HIDDEN, HIDDEN)), HP, HP)
        wqkv.append(jnp.concatenate([q_w, k_w, v_w], axis=1).astype(jnp.bfloat16))
        bqkv.append(zero_bias(3 * HP))
        wo.append(padw(nrm((HIDDEN, HIDDEN)), HP, HP))
        bo.append(zero_bias(HP))
        ln1g.append(ln_gamma(HIDDEN, HP))
        ln1b.append(zero_bias(HP))
        wf1.append(padw(nrm((HIDDEN, INTERMEDIATE)), HP, IP))
        bf1.append(zero_bias(IP))
        wf2.append(padw(nrm((INTERMEDIATE, HIDDEN)), IP, HP))
        bf2.append(zero_bias(HP))
        ln2g.append(ln_gamma(HIDDEN, HP))
        ln2b.append(zero_bias(HP))

    stack = lambda xs: jnp.stack(xs, axis=0)        # leading layer axis

    return {
        # embeddings (kept f32, lane-padded once; padded lanes are zero)
        "word_emb": _pad2(nrm((VOCAB, HIDDEN)), VOCAB, HP),
        "pos_emb": _pad2(nrm((MAX_POS, HIDDEN)), MAX_POS, HP),
        "type_emb": _pad2(nrm((TYPE_VOCAB, HIDDEN)), TYPE_VOCAB, HP),
        "emb_ln_g": ln_gamma(HIDDEN, HP),
        "emb_ln_b": zero_bias(HP),
        # stacked per-layer encoder weights (L, ...)
        "wqkv": stack(wqkv), "bqkv": stack(bqkv),
        "wo": stack(wo), "bo": stack(bo),
        "ln1_g": stack(ln1g), "ln1_b": stack(ln1b),
        "ff1_w": stack(wf1), "ff1_b": stack(bf1),
        "ff2_w": stack(wf2), "ff2_b": stack(bf2),
        "ln2_g": stack(ln2g), "ln2_b": stack(ln2b),
        # MLM head (BertLMPredictionHead: transform + decoder to vocab)
        "mlm_w": padw(nrm((HIDDEN, HIDDEN)), HP, HP),
        "mlm_b": zero_bias(HP),
        "mlm_ln_g": ln_gamma(HIDDEN, HP),
        "mlm_ln_b": zero_bias(HP),
        "dec_w": padw(nrm((HIDDEN, VOCAB)), HP, VP),
        "dec_b": zero_bias(VP),
        # classification head (21128->21128, 21128->3 in the original)
        "pre_w": padw(nrm((VOCAB, VOCAB)), VP, VP),
        "pre_b": zero_bias(VP),
        "cls_w": padw(nrm((VOCAB, NUM_CLASSES)), VP, CP),
        "cls_b": zero_bias(CP),
    }


# ----------------------------- forward pass ----------------------------------
def bert_class_forward(params, input_ids, attention_mask, token_type_ids):
    B, S = input_ids.shape

    # Embedding gathers are JAX glue (tables are pre-padded; no per-call pads).
    x = (params["word_emb"][input_ids]
         + params["pos_emb"][jnp.arange(S)][None, :, :]
         + params["type_emb"][token_type_ids])                  # (B, S, HP)
    amask = ((1.0 - attention_mask.astype(jnp.float32)) * -1e9
             ).reshape(B, 1, S)                                  # additive mask

    def const_spec(a):
        zeros = (0,) * a.ndim
        return pl.BlockSpec(a.shape, lambda b, l: zeros)

    def per_layer_spec(a):
        tail = (0,) * (a.ndim - 1)
        return pl.BlockSpec((None,) + a.shape[1:], lambda b, l: (l,) + tail)

    def per_batch_spec(a):
        tail = (0,) * (a.ndim - 1)
        return pl.BlockSpec((None,) + a.shape[1:], lambda b, l: (b,) + tail)

    kern = functools.partial(_bert_kernel, seq=S, num_heads=NUM_HEADS,
                             head_dim=HEAD_DIM, hidden=HIDDEN)

    out = pl.pallas_call(
        kern,
        out_shape=jax.ShapeDtypeStruct((B, 1, CP), jnp.float32),
        grid_spec=pltpu.PrefetchScalarGridSpec(
            num_scalar_prefetch=0,
            grid=(B, NUM_LAYERS),                   # (parallel, arbitrary)
            in_specs=[
                per_batch_spec(x),                  # summed embeddings
                const_spec(params["emb_ln_g"]),
                const_spec(params["emb_ln_b"]),
                per_batch_spec(amask),
                per_layer_spec(params["wqkv"]),
                per_layer_spec(params["bqkv"]),
                per_layer_spec(params["wo"]),
                per_layer_spec(params["bo"]),
                per_layer_spec(params["ln1_g"]),
                per_layer_spec(params["ln1_b"]),
                per_layer_spec(params["ff1_w"]),
                per_layer_spec(params["ff1_b"]),
                per_layer_spec(params["ff2_w"]),
                per_layer_spec(params["ff2_b"]),
                per_layer_spec(params["ln2_g"]),
                per_layer_spec(params["ln2_b"]),
                const_spec(params["mlm_w"]),
                const_spec(params["mlm_b"]),
                const_spec(params["mlm_ln_g"]),
                const_spec(params["mlm_ln_b"]),
                const_spec(params["dec_w"]),
                const_spec(params["dec_b"]),
                const_spec(params["pre_w"]),
                const_spec(params["pre_b"]),
                const_spec(params["cls_w"]),
                const_spec(params["cls_b"]),
            ],
            out_specs=pl.BlockSpec((None, 1, CP), lambda b, l: (b, 0, 0)),
            # hidden state stays resident in VMEM across the layer axis
            scratch_shapes=[pltpu.VMEM((S, HP), jnp.float32)],
        ),
        compiler_params=pltpu.CompilerParams(
            dimension_semantics=("parallel", "arbitrary"),
            vmem_limit_bytes=32 * 1024 * 1024),
    )(x, params["emb_ln_g"], params["emb_ln_b"], amask,
      params["wqkv"], params["bqkv"], params["wo"], params["bo"],
      params["ln1_g"], params["ln1_b"], params["ff1_w"], params["ff1_b"],
      params["ff2_w"], params["ff2_b"], params["ln2_g"], params["ln2_b"],
      params["mlm_w"], params["mlm_b"], params["mlm_ln_g"], params["mlm_ln_b"],
      params["dec_w"], params["dec_b"], params["pre_w"], params["pre_b"],
      params["cls_w"], params["cls_b"])

    return out.reshape(B, CP)[:, :NUM_CLASSES]      # (B, 3)


# ----------------------------- main ------------------------------------------
if __name__ == "__main__":
    key = jax.random.PRNGKey(0)
    k_param, k_ids, k_type = jax.random.split(key, 3)

    params = init_params(k_param)

    input_ids = jax.random.randint(k_ids, (BATCH, SEQ), 0, VOCAB,
                                   dtype=jnp.int32)
    attention_mask = jnp.ones((BATCH, SEQ), dtype=jnp.int32)
    attention_mask = attention_mask.at[:, -2:].set(0)   # some padding
    token_type_ids = jax.random.randint(k_type, (BATCH, SEQ), 0, TYPE_VOCAB,
                                        dtype=jnp.int32)

    out = jax.jit(bert_class_forward)(params, input_ids, attention_mask,
                                      token_type_ids)
    out = jax.block_until_ready(out)
    assert out.shape == (BATCH, NUM_CLASSES), out.shape
    assert bool(jnp.all(jnp.isfinite(out)))
    print("KERNEL_OK")
</pallas_src>

<mosaic_0001>
module attributes {stable_mosaic.version = 11 : i64} {
  func.func @_bert_kernel(%arg0: i32, %arg1: i32, %arg2: memref<1x8x128xf32, #tpu.memory_space<vmem>>, %arg3: memref<1x128xf32, #tpu.memory_space<vmem>>, %arg4: memref<1x128xf32, #tpu.memory_space<vmem>>, %arg5: memref<1x1x8xf32, #tpu.memory_space<vmem>>, %arg6: memref<1x128x384xbf16, #tpu.memory_space<vmem>>, %arg7: memref<1x1x384xf32, #tpu.memory_space<vmem>>, %arg8: memref<1x128x128xbf16, #tpu.memory_space<vmem>>, %arg9: memref<1x1x128xf32, #tpu.memory_space<vmem>>, %arg10: memref<1x1x128xf32, #tpu.memory_space<vmem>>, %arg11: memref<1x1x128xf32, #tpu.memory_space<vmem>>, %arg12: memref<1x128x128xbf16, #tpu.memory_space<vmem>>, %arg13: memref<1x1x128xf32, #tpu.memory_space<vmem>>, %arg14: memref<1x128x128xbf16, #tpu.memory_space<vmem>>, %arg15: memref<1x1x128xf32, #tpu.memory_space<vmem>>, %arg16: memref<1x1x128xf32, #tpu.memory_space<vmem>>, %arg17: memref<1x1x128xf32, #tpu.memory_space<vmem>>, %arg18: memref<128x128xbf16, #tpu.memory_space<vmem>>, %arg19: memref<1x128xf32, #tpu.memory_space<vmem>>, %arg20: memref<1x128xf32, #tpu.memory_space<vmem>>, %arg21: memref<1x128xf32, #tpu.memory_space<vmem>>, %arg22: memref<128x256xbf16, #tpu.memory_space<vmem>>, %arg23: memref<1x256xf32, #tpu.memory_space<vmem>>, %arg24: memref<256x256xbf16, #tpu.memory_space<vmem>>, %arg25: memref<1x256xf32, #tpu.memory_space<vmem>>, %arg26: memref<256x128xbf16, #tpu.memory_space<vmem>>, %arg27: memref<1x128xf32, #tpu.memory_space<vmem>>, %arg28: memref<1x1x128xf32, #tpu.memory_space<vmem>>, %arg29: memref<8x128xf32, #tpu.memory_space<vmem>>) attributes {dimension_semantics = [#tpu.dimension_semantics<parallel>, #tpu.dimension_semantics<arbitrary>], iteration_bounds = array<i64: 2, 2>, scalar_prefetch = 0 : i64, scratch_operands = 1 : i64, tpu.core_type = #tpu.core_type<tc>, window_params = [{transform_indices = @transform_0, window_bounds = array<i64: 1, 8, 128>}, {pipeline_mode = #tpu.pipeline_mode<synchronous>, transform_indices = @transform_1, window_bounds = array<i64: 1, 128>}, {pipeline_mode = #tpu.pipeline_mode<synchronous>, transform_indices = @transform_2, window_bounds = array<i64: 1, 128>}, {transform_indices = @transform_3, window_bounds = array<i64: 1, 1, 8>}, {transform_indices = @transform_4, window_bounds = array<i64: 1, 128, 384>}, {transform_indices = @transform_5, window_bounds = array<i64: 1, 1, 384>}, {transform_indices = @transform_6, window_bounds = array<i64: 1, 128, 128>}, {transform_indices = @transform_7, window_bounds = array<i64: 1, 1, 128>}, {transform_indices = @transform_8, window_bounds = array<i64: 1, 1, 128>}, {transform_indices = @transform_9, window_bounds = array<i64: 1, 1, 128>}, {transform_indices = @transform_10, window_bounds = array<i64: 1, 128, 128>}, {transform_indices = @transform_11, window_bounds = array<i64: 1, 1, 128>}, {transform_indices = @transform_12, window_bounds = array<i64: 1, 128, 128>}, {transform_indices = @transform_13, window_bounds = array<i64: 1, 1, 128>}, {transform_indices = @transform_14, window_bounds = array<i64: 1, 1, 128>}, {transform_indices = @transform_15, window_bounds = array<i64: 1, 1, 128>}, {pipeline_mode = #tpu.pipeline_mode<synchronous>, transform_indices = @transform_16, window_bounds = array<i64: 128, 128>}, {pipeline_mode = #tpu.pipeline_mode<synchronous>, transform_indices = @transform_17, window_bounds = array<i64: 1, 128>}, {pipeline_mode = #tpu.pipeline_mode<synchronous>, transform_indices = @transform_18, window_bounds = array<i64: 1, 128>}, {pipeline_mode = #tpu.pipeline_mode<synchronous>, transform_indices = @transform_19, window_bounds = array<i64: 1, 128>}, {pipeline_mode = #tpu.pipeline_mode<synchronous>, transform_indices = @transform_20, window_bounds = array<i64: 128, 256>}, {pipeline_mode = #tpu.pipeline_mode<synchronous>, transform_indices = @transform_21, window_bounds = array<i64: 1, 256>}, {pipeline_mode = #tpu.pipeline_mode<synchronous>, transform_indices = @transform_22, window_bounds = array<i64: 256, 256>}, {pipeline_mode = #tpu.pipeline_mode<synchronous>, transform_indices = @transform_23, window_bounds = array<i64: 1, 256>}, {pipeline_mode = #tpu.pipeline_mode<synchronous>, transform_indices = @transform_24, window_bounds = array<i64: 256, 128>}, {pipeline_mode = #tpu.pipeline_mode<synchronous>, transform_indices = @transform_25, window_bounds = array<i64: 1, 128>}, {transform_indices = @transform_26, window_bounds = array<i64: 1, 1, 128>}]} {
    %c0_i32 = arith.constant 0 : i32
    %0 = arith.cmpi eq, %arg1, %c0_i32 : i32
    %1 = arith.extui %0 : i1 to i32
    %c0_i32_0 = arith.constant 0 : i32
    %2 = arith.cmpi ne, %1, %c0_i32_0 : i32
    scf.if %2 {
      %c0_69 = arith.constant 0 : index
      %c0_70 = arith.constant 0 : index
      %c0_71 = arith.constant 0 : index
      %161 = vector.load %arg2[%c0_69, %c0_70, %c0_71] : memref<1x8x128xf32, #tpu.memory_space<vmem>>, vector<1x8x128xf32>
      %162 = vector.shape_cast %161 : vector<1x8x128xf32> to vector<8x128xf32>
      %c0_72 = arith.constant 0 : index
      %c0_73 = arith.constant 0 : index
      %163 = vector.load %arg3[%c0_72, %c0_73] : memref<1x128xf32, #tpu.memory_space<vmem>>, vector<1x128xf32>
      %c0_74 = arith.constant 0 : index
      %c0_75 = arith.constant 0 : index
      %164 = vector.load %arg4[%c0_74, %c0_75] : memref<1x128xf32, #tpu.memory_space<vmem>>, vector<1x128xf32>
      %cst_76 = arith.constant dense<0.000000e+00> : vector<8xf32>
      %165 = vector.multi_reduction <add>, %162, %cst_76 [1] : vector<8x128xf32> to vector<8xf32>
      %166 = vector.shape_cast %165 : vector<8xf32> to vector<8x1xf32>
      %cst_77 = arith.constant 3.125000e-02 : f32
      %167 = vector.broadcast %cst_77 : f32 to vector<8x1xf32>
      %168 = arith.mulf %166, %167 : vector<8x1xf32>
      %169 = arith.mulf %162, %162 : vector<8x128xf32>
      %cst_78 = arith.constant dense<0.000000e+00> : vector<8xf32>
      %170 = vector.multi_reduction <add>, %169, %cst_78 [1] : vector<8x128xf32> to vector<8xf32>
      %171 = vector.shape_cast %170 : vector<8xf32> to vector<8x1xf32>
      %cst_79 = arith.constant 3.125000e-02 : f32
      %172 = vector.broadcast %cst_79 : f32 to vector<8x1xf32>
      %173 = arith.mulf %171, %172 : vector<8x1xf32>
      %174 = arith.mulf %168, %168 : vector<8x1xf32>
      %175 = arith.subf %173, %174 : vector<8x1xf32>
      %cst_80 = arith.constant 0.000000e+00 : f32
      %176 = vector.broadcast %cst_80 : f32 to vector<8x1xf32>
      %177 = arith.maximumf %175, %176 : vector<8x1xf32>
      %cst_81 = arith.constant 9.99999996E-13 : f32
      %178 = vector.broadcast %cst_81 : f32 to vector<8x1xf32>
      %179 = arith.addf %177, %178 : vector<8x1xf32>
      %180 = math.rsqrt %179 : vector<8x1xf32>
      %181 = vector.broadcast %168 : vector<8x1xf32> to vector<8x128xf32>
      %182 = arith.subf %162, %181 : vector<8x128xf32>
      %183 = vector.broadcast %180 : vector<8x1xf32> to vector<8x128xf32>
      %184 = arith.mulf %182, %183 : vector<8x128xf32>
      %185 = vector.broadcast %163 : vector<1x128xf32> to vector<8x128xf32>
      %186 = arith.mulf %184, %185 : vector<8x128xf32>
      %187 = vector.broadcast %164 : vector<1x128xf32> to vector<8x128xf32>
      %188 = arith.addf %186, %187 : vector<8x128xf32>
      %c0_82 = arith.constant 0 : index
      %c0_83 = arith.constant 0 : index
      %189 = vector.load %arg29[%c0_82, %c0_83] : memref<8x128xf32, #tpu.memory_space<vmem>>, vector<8x128xf32>
      tpu.vector_store %arg29[%c0_82, %c0_83], %188 {strides = array<i32>} : memref<8x128xf32, #tpu.memory_space<vmem>>, vector<8x128xf32>,
    } else {
    }
    %c0 = arith.constant 0 : index
    %c0_1 = arith.constant 0 : index
    %3 = vector.load %arg29[%c0, %c0_1] : memref<8x128xf32, #tpu.memory_space<vmem>>, vector<8x128xf32>
    %4 = tpu.iota {dimensions = array<i32: 1>} : vector<1x128xi32>
    %c0_i32_2 = arith.constant 0 : i32
    %5 = vector.broadcast %c0_i32_2 : i32 to vector<1x128xi32>
    %6 = arith.cmpi sge, %4, %5 : vector<1x128xi32>
    %c16_i32 = arith.constant 16 : i32
    %7 = vector.broadcast %c16_i32 : i32 to vector<1x128xi32>
    %8 = arith.cmpi slt, %4, %7 : vector<1x128xi32>
    %9 = arith.andi %6, %8 : vector<1x128xi1>
    %10 = arith.extui %9 : vector<1x128xi1> to vector<1x128xi32>
    %11 = arith.sitofp %10 : vector<1x128xi32> to vector<1x128xf32>
    %c16_i32_3 = arith.constant 16 : i32
    %12 = vector.broadcast %c16_i32_3 : i32 to vector<1x128xi32>
    %13 = arith.cmpi sge, %4, %12 : vector<1x128xi32>
    %c32_i32 = arith.constant 32 : i32
    %14 = vector.broadcast %c32_i32 : i32 to vector<1x128xi32>
    %15 = arith.cmpi slt, %4, %14 : vector<1x128xi32>
    %16 = arith.andi %13, %15 : vector<1x128xi1>
    %17 = arith.extui %16 : vector<1x128xi1> to vector<1x128xi32>
    %18 = arith.sitofp %17 : vector<1x128xi32> to vector<1x128xf32>
    %c0_4 = arith.constant 0 : index
    %c0_5 = arith.constant 0 : index
    %c0_6 = arith.constant 0 : index
    %19 = vector.load %arg6[%c0_4, %c0_5, %c0_6] : memref<1x128x384xbf16, #tpu.memory_space<vmem>>, vector<1x128x384xbf16>
    %20 = vector.shape_cast %19 : vector<1x128x384xbf16> to vector<128x384xbf16>
    %21 = arith.truncf %3 : vector<8x128xf32> to vector<8x128xbf16>
    %cst = arith.constant dense<0.000000e+00> : vector<8x384xf32>
    %22 = tpu.matmul %21, %20, %cst {dimension_numbers = #tpu.dot_dimension_numbers<[1], [0], [0], [1], [0, 0, 1, 1], [], []>} : vector<8x128xbf16>, vector<128x384xbf16>, vector<8x384xf32> -> vector<8x384xf32>
    %c0_7 = arith.constant 0 : index
    %c0_8 = arith.constant 0 : index
    %c0_9 = arith.constant 0 : index
    %23 = vector.load %arg7[%c0_7, %c0_8, %c0_9] : memref<1x1x384xf32, #tpu.memory_space<vmem>>, vector<1x1x384xf32>
    %24 = vector.shape_cast %23 : vector<1x1x384xf32> to vector<1x384xf32>
    %25 = vector.broadcast %24 : vector<1x384xf32> to vector<8x384xf32>
    %26 = arith.addf %22, %25 : vector<8x384xf32>
    %27 = vector.extract_strided_slice %26 {offsets = [0, 0], sizes = [8, 128], strides = [1, 1]} : vector<8x384xf32> to vector<8x128xf32>
    %28 = vector.extract_strided_slice %26 {offsets = [0, 128], sizes = [8, 128], strides = [1, 1]} : vector<8x384xf32> to vector<8x128xf32>
    %29 = arith.truncf %28 : vector<8x128xf32> to vector<8x128xbf16>
    %30 = vector.extract_strided_slice %26 {offsets = [0, 256], sizes = [8, 128], strides = [1, 1]} : vector<8x384xf32> to vector<8x128xf32>
    %31 = arith.truncf %30 : vector<8x128xf32> to vector<8x128xbf16>
    %32 = vector.broadcast %11 : vector<1x128xf32> to vector<8x128xf32>
    %33 = arith.mulf %27, %32 : vector<8x128xf32>
    %34 = vector.broadcast %18 : vector<1x128xf32> to vector<8x128xf32>
    %35 = arith.mulf %27, %34 : vector<8x128xf32>
    %36 = tpu.concatenate %33, %35 in 0 : vector<8x128xf32>, vector<8x128xf32> -> vector<16x128xf32>
    %37 = arith.truncf %36 : vector<16x128xf32> to vector<16x128xbf16>
    %cst_10 = arith.constant dense<0.000000e+00> : vector<16x8xf32>
    %38 = tpu.matmul %37, %29, %cst_10 {dimension_numbers = #tpu.dot_dimension_numbers<[1], [1], [0], [0], [0, 0, 1, 0], [], []>} : vector<16x128xbf16>, vector<8x128xbf16>, vector<16x8xf32> -> vector<16x8xf32>
    %c0_11 = arith.constant 0 : index
    %c0_12 = arith.constant 0 : index
    %c0_13 = arith.constant 0 : index
    %39 = vector.load %arg5[%c0_11, %c0_12, %c0_13] : memref<1x1x8xf32, #tpu.memory_space<vmem>>, vector<1x1x8xf32>
    %40 = vector.shape_cast %39 : vector<1x1x8xf32> to vector<1x8xf32>
    %41 = vector.broadcast %40 : vector<1x8xf32> to vector<16x8xf32>
    %42 = arith.addf %38, %41 : vector<16x8xf32>
    %cst_14 = arith.constant dense<0xFF800000> : vector<16xf32>
    %43 = vector.multi_reduction <maximumf>, %42, %cst_14 [1] : vector<16x8xf32> to vector<16xf32>
    %44 = vector.shape_cast %43 : vector<16xf32> to vector<16x1xf32>
    %45 = vector.broadcast %44 : vector<16x1xf32> to vector<16x8xf32>
    %46 = arith.subf %42, %45 : vector<16x8xf32>
    %47 = math.exp %46 : vector<16x8xf32>
    %cst_15 = arith.constant dense<0.000000e+00> : vector<16xf32>
    %48 = vector.multi_reduction <add>, %47, %cst_15 [1] : vector<16x8xf32> to vector<16xf32>
    %49 = vector.shape_cast %48 : vector<16xf32> to vector<16x1xf32>
    %50 = tpu.reciprocal %49 {approx = true} : vector<16x1xf32> -> vector<16x1xf32>
    %51 = vector.broadcast %50 : vector<16x1xf32> to vector<16x8xf32>
    %52 = arith.mulf %47, %51 : vector<16x8xf32>
    %53 = arith.truncf %52 : vector<16x8xf32> to vector<16x8xbf16>
    %cst_16 = arith.constant dense<0.000000e+00> : vector<16x128xf32>
    %54 = tpu.matmul %53, %31, %cst_16 {dimension_numbers = #tpu.dot_dimension_numbers<[1], [0], [0], [1], [0, 0, 1, 1], [], []>} : vector<16x8xbf16>, vector<8x128xbf16>, vector<16x128xf32> -> vector<16x128xf32>
    %55 = vector.extract_strided_slice %54 {offsets = [0, 0], sizes = [8, 128], strides = [1, 1]} : vector<16x128xf32> to vector<8x128xf32>
    %56 = vector.broadcast %11 : vector<1x128xf32> to vector<8x128xf32>
    %57 = arith.mulf %55, %56 : vector<8x128xf32>
    %58 = vector.extract_strided_slice %54 {offsets = [8, 0], sizes = [8, 128], strides = [1, 1]} : vector<16x128xf32> to vector<8x128xf32>
    %59 = vector.broadcast %18 : vector<1x128xf32> to vector<8x128xf32>
    %60 = arith.mulf %58, %59 : vector<8x128xf32>
    %61 = arith.addf %57, %60 : vector<8x128xf32>
    %c0_17 = arith.constant 0 : index
    %c0_18 = arith.constant 0 : index
    %c0_19 = arith.constant 0 : index
    %62 = vector.load %arg8[%c0_17, %c0_18, %c0_19] : memref<1x128x128xbf16, #tpu.memory_space<vmem>>, vector<1x128x128xbf16>
    %63 = vector.shape_cast %62 : vector<1x128x128xbf16> to vector<128x128xbf16>
    %64 = arith.truncf %61 : vector<8x128xf32> to vector<8x128xbf16>
    %cst_20 = arith.constant dense<0.000000e+00> : vector<8x128xf32>
    %65 = tpu.matmul %64, %63, %cst_20 {dimension_numbers = #tpu.dot_dimension_numbers<[1], [0], [0], [1], [0, 0, 1, 1], [], []>} : vector<8x128xbf16>, vector<128x128xbf16>, vector<8x128xf32> -> vector<8x128xf32>
    %c0_21 = arith.constant 0 : index
    %c0_22 = arith.constant 0 : index
    %c0_23 = arith.constant 0 : index
    %66 = vector.load %arg9[%c0_21, %c0_22, %c0_23] : memref<1x1x128xf32, #tpu.memory_space<vmem>>, vector<1x1x128xf32>
    %67 = vector.shape_cast %66 : vector<1x1x128xf32> to vector<1x128xf32>
    %68 = vector.broadcast %67 : vector<1x128xf32> to vector<8x128xf32>
    %69 = arith.addf %65, %68 : vector<8x128xf32>
    %70 = arith.addf %69, %3 : vector<8x128xf32>
    %c0_24 = arith.constant 0 : index
    %c0_25 = arith.constant 0 : index
    %c0_26 = arith.constant 0 : index
    %71 = vector.load %arg10[%c0_24, %c0_25, %c0_26] : memref<1x1x128xf32, #tpu.memory_space<vmem>>, vector<1x1x128xf32>
    %72 = vector.shape_cast %71 : vector<1x1x128xf32> to vector<1x128xf32>
    %c0_27 = arith.constant 0 : index
    %c0_28 = arith.constant 0 : index
    %c0_29 = arith.constant 0 : index
    %73 = vector.load %arg11[%c0_27, %c0_28, %c0_29] : memref<1x1x128xf32, #tpu.memory_space<vmem>>, vector<1x1x128xf32>
    %74 = vector.shape_cast %73 : vector<1x1x128xf32> to vector<1x128xf32>
    %cst_30 = arith.constant dense<0.000000e+00> : vector<8xf32>
    %75 = vector.multi_reduction <add>, %70, %cst_30 [1] : vector<8x128xf32> to vector<8xf32>
    %76 = vector.shape_cast %75 : vector<8xf32> to vector<8x1xf32>
    %cst_31 = arith.constant 3.125000e-02 : f32
    %77 = vector.broadcast %cst_31 : f32 to vector<8x1xf32>
    %78 = arith.mulf %76, %77 : vector<8x1xf32>
    %79 = arith.mulf %70, %70 : vector<8x128xf32>
    %cst_32 = arith.constant dense<0.000000e+00> : vector<8xf32>
    %80 = vector.multi_reduction <add>, %79, %cst_32 [1] : vector<8x128xf32> to vector<8xf32>
    %81 = vector.shape_cast %80 : vector<8xf32> to vector<8x1xf32>
    %cst_33 = arith.constant 3.125000e-02 : f32
    %82 = vector.broadcast %cst_33 : f32 to vector<8x1xf32>
    %83 = arith.mulf %81, %82 : vector<8x1xf32>
    %84 = arith.mulf %78, %78 : vector<8x1xf32>
    %85 = arith.subf %83, %84 : vector<8x1xf32>
    %cst_34 = arith.constant 0.000000e+00 : f32
    %86 = vector.broadcast %cst_34 : f32 to vector<8x1xf32>
    %87 = arith.maximumf %85, %86 : vector<8x1xf32>
    %cst_35 = arith.constant 9.99999996E-13 : f32
    %88 = vector.broadcast %cst_35 : f32 to vector<8x1xf32>
    %89 = arith.addf %87, %88 : vector<8x1xf32>
    %90 = math.rsqrt %89 : vector<8x1xf32>
    %91 = vector.broadcast %78 : vector<8x1xf32> to vector<8x128xf32>
    %92 = arith.subf %70, %91 : vector<8x128xf32>
    %93 = vector.broadcast %90 : vector<8x1xf32> to vector<8x128xf32>
    %94 = arith.mulf %92, %93 : vector<8x128xf32>
    %95 = vector.broadcast %72 : vector<1x128xf32> to vector<8x128xf32>
    %96 = arith.mulf %94, %95 : vector<8x128xf32>
    %97 = vector.broadcast %74 : vector<1x128xf32> to vector<8x128xf32>
    %98 = arith.addf %96, %97 : vector<8x128xf32>
    %c0_36 = arith.constant 0 : index
    %c0_37 = arith.constant 0 : index
    %c0_38 = arith.constant 0 : index
    %99 = vector.load %arg12[%c0_36, %c0_37, %c0_38] : memref<1x128x128xbf16, #tpu.memory_space<vmem>>, vector<1x128x128xbf16>
    %100 = vector.shape_cast %99 : vector<1x128x128xbf16> to vector<128x128xbf16>
    %101 = arith.truncf %98 : vector<8x128xf32> to vector<8x128xbf16>
    %cst_39 = arith.constant dense<0.000000e+00> : vector<8x128xf32>
    %102 = tpu.matmul %101, %100, %cst_39 {dimension_numbers = #tpu.dot_dimension_numbers<[1], [0], [0], [1], [0, 0, 1, 1], [], []>} : vector<8x128xbf16>, vector<128x128xbf16>, vector<8x128xf32> -> vector<8x128xf32>
    %c0_40 = arith.constant 0 : index
    %c0_41 = arith.constant 0 : index
    %c0_42 = arith.constant 0 : index
    %103 = vector.load %arg13[%c0_40, %c0_41, %c0_42] : memref<1x1x128xf32, #tpu.memory_space<vmem>>, vector<1x1x128xf32>
    %104 = vector.shape_cast %103 : vector<1x1x128xf32> to vector<1x128xf32>
    %105 = vector.broadcast %104 : vector<1x128xf32> to vector<8x128xf32>
    %106 = arith.addf %102, %105 : vector<8x128xf32>
    %107 = arith.mulf %106, %106 : vector<8x128xf32>
    %108 = arith.mulf %106, %107 : vector<8x128xf32>
    %cst_43 = arith.constant 4.471500e-02 : f32
    %109 = vector.broadcast %cst_43 : f32 to vector<8x128xf32>
    %110 = arith.mulf %109, %108 : vector<8x128xf32>
    %111 = arith.addf %106, %110 : vector<8x128xf32>
    %cst_44 = arith.constant 0.797884583 : f32
    %112 = vector.broadcast %cst_44 : f32 to vector<8x128xf32>
    %113 = arith.mulf %112, %111 : vector<8x128xf32>
    %114 = math.tanh %113 : vector<8x128xf32>
    %cst_45 = arith.constant 1.000000e+00 : f32
    %115 = vector.broadcast %cst_45 : f32 to vector<8x128xf32>
    %116 = arith.addf %115, %114 : vector<8x128xf32>
    %cst_46 = arith.constant 5.000000e-01 : f32
    %117 = vector.broadcast %cst_46 : f32 to vector<8x128xf32>
    %118 = arith.mulf %117, %116 : vector<8x128xf32>
    %119 = arith.mulf %106, %118 : vector<8x128xf32>
    %c0_47 = arith.constant 0 : index
    %c0_48 = arith.constant 0 : index
    %c0_49 = arith.constant 0 : index
    %120 = vector.load %arg14[%c0_47, %c0_48, %c0_49] : memref<1x128x128xbf16, #tpu.memory_space<vmem>>, vector<1x128x128xbf16>
    %121 = vector.shape_cast %120 : vector<1x128x128xbf16> to vector<128x128xbf16>
    %122 = arith.truncf %119 : vector<8x128xf32> to vector<8x128xbf16>
    %cst_50 = arith.constant dense<0.000000e+00> : vector<8x128xf32>
    %123 = tpu.matmul %122, %121, %cst_50 {dimension_numbers = #tpu.dot_dimension_numbers<[1], [0], [0], [1], [0, 0, 1, 1], [], []>} : vector<8x128xbf16>, vector<128x128xbf16>, vector<8x128xf32> -> vector<8x128xf32>
    %c0_51 = arith.constant 0 : index
    %c0_52 = arith.constant 0 : index
    %c0_53 = arith.constant 0 : index
    %124 = vector.load %arg15[%c0_51, %c0_52, %c0_53] : memref<1x1x128xf32, #tpu.memory_space<vmem>>, vector<1x1x128xf32>
    %125 = vector.shape_cast %124 : vector<1x1x128xf32> to vector<1x128xf32>
    %126 = vector.broadcast %125 : vector<1x128xf32> to vector<8x128xf32>
    %127 = arith.addf %123, %126 : vector<8x128xf32>
    %128 = arith.addf %127, %98 : vector<8x128xf32>
    %c0_54 = arith.constant 0 : index
    %c0_55 = arith.constant 0 : index
    %c0_56 = arith.constant 0 : index
    %129 = vector.load %arg16[%c0_54, %c0_55, %c0_56] : memref<1x1x128xf32, #tpu.memory_space<vmem>>, vector<1x1x128xf32>
    %130 = vector.shape_cast %129 : vector<1x1x128xf32> to vector<1x128xf32>
    %c0_57 = arith.constant 0 : index
    %c0_58 = arith.constant 0 : index
    %c0_59 = arith.constant 0 : index
    %131 = vector.load %arg17[%c0_57, %c0_58, %c0_59] : memref<1x1x128xf32, #tpu.memory_space<vmem>>, vector<1x1x128xf32>
    %132 = vector.shape_cast %131 : vector<1x1x128xf32> to vector<1x128xf32>
    %cst_60 = arith.constant dense<0.000000e+00> : vector<8xf32>
    %133 = vector.multi_reduction <add>, %128, %cst_60 [1] : vector<8x128xf32> to vector<8xf32>
    %134 = vector.shape_cast %133 : vector<8xf32> to vector<8x1xf32>
    %cst_61 = arith.constant 3.125000e-02 : f32
    %135 = vector.broadcast %cst_61 : f32 to vector<8x1xf32>
    %136 = arith.mulf %134, %135 : vector<8x1xf32>
    %137 = arith.mulf %128, %128 : vector<8x128xf32>
    %cst_62 = arith.constant dense<0.000000e+00> : vector<8xf32>
    %138 = vector.multi_reduction <add>, %137, %cst_62 [1] : vector<8x128xf32> to vector<8xf32>
    %139 = vector.shape_cast %138 : vector<8xf32> to vector<8x1xf32>
    %cst_63 = arith.constant 3.125000e-02 : f32
    %140 = vector.broadcast %cst_63 : f32 to vector<8x1xf32>
    %141 = arith.mulf %139, %140 : vector<8x1xf32>
    %142 = arith.mulf %136, %136 : vector<8x1xf32>
    %143 = arith.subf %141, %142 : vector<8x1xf32>
    %cst_64 = arith.constant 0.000000e+00 : f32
    %144 = vector.broadcast %cst_64 : f32 to vector<8x1xf32>
    %145 = arith.maximumf %143, %144 : vector<8x1xf32>
    %cst_65 = arith.constant 9.99999996E-13 : f32
    %146 = vector.broadcast %cst_65 : f32 to vector<8x1xf32>
    %147 = arith.addf %145, %146 : vector<8x1xf32>
    %148 = math.rsqrt %147 : vector<8x1xf32>
    %149 = vector.broadcast %136 : vector<8x1xf32> to vector<8x128xf32>
    %150 = arith.subf %128, %149 : vector<8x128xf32>
    %151 = vector.broadcast %148 : vector<8x1xf32> to vector<8x128xf32>
    %152 = arith.mulf %150, %151 : vector<8x128xf32>
    %153 = vector.broadcast %130 : vector<1x128xf32> to vector<8x128xf32>
    %154 = arith.mulf %152, %153 : vector<8x128xf32>
    %155 = vector.broadcast %132 : vector<1x128xf32> to vector<8x128xf32>
    %156 = arith.addf %154, %155 : vector<8x128xf32>
    %c0_66 = arith.constant 0 : index
    %c0_67 = arith.constant 0 : index
    %157 = vector.load %arg29[%c0_66, %c0_67] : memref<8x128xf32, #tpu.memory_space<vmem>>, vector<8x128xf32>
    tpu.vector_store %arg29[%c0_66, %c0_67], %156 {strides = array<i32>} : memref<8x128xf32, #tpu.memory_space<vmem>>, vector<8x128xf32>,
    %c1_i32 = arith.constant 1 : i32
    %158 = arith.cmpi eq, %arg1, %c1_i32 : i32
    %159 = arith.extui %158 : i1 to i32
    %c0_i32_68 = arith.constant 0 : i32
    %160 = arith.cmpi ne, %159, %c0_i32_68 : i32
    scf.if %160 {
      %161 = vector.extract_strided_slice %156 {offsets = [0, 0], sizes = [1, 128], strides = [1, 1]} : vector<8x128xf32> to vector<1x128xf32>
      %c0_69 = arith.constant 0 : index
      %c0_70 = arith.constant 0 : index
      %162 = vector.load %arg18[%c0_69, %c0_70] : memref<128x128xbf16, #tpu.memory_space<vmem>>, vector<128x128xbf16>
      %163 = arith.truncf %161 : vector<1x128xf32> to vector<1x128xbf16>
      %cst_71 = arith.constant dense<0.000000e+00> : vector<1x128xf32>
      %164 = tpu.matmul %163, %162, %cst_71 {dimension_numbers = #tpu.dot_dimension_numbers<[1], [0], [0], [1], [0, 0, 1, 1], [], []>} : vector<1x128xbf16>, vector<128x128xbf16>, vector<1x128xf32> -> vector<1x128xf32>
      %c0_72 = arith.constant 0 : index
      %c0_73 = arith.constant 0 : index
      %165 = vector.load %arg19[%c0_72, %c0_73] : memref<1x128xf32, #tpu.memory_space<vmem>>, vector<1x128xf32>
      %166 = arith.addf %164, %165 : vector<1x128xf32>
      %167 = arith.mulf %166, %166 : vector<1x128xf32>
      %168 = arith.mulf %166, %167 : vector<1x128xf32>
      %cst_74 = arith.constant 4.471500e-02 : f32
      %169 = vector.broadcast %cst_74 : f32 to vector<1x128xf32>
      %170 = arith.mulf %169, %168 : vector<1x128xf32>
      %171 = arith.addf %166, %170 : vector<1x128xf32>
      %cst_75 = arith.constant 0.797884583 : f32
      %172 = vector.broadcast %cst_75 : f32 to vector<1x128xf32>
      %173 = arith.mulf %172, %171 : vector<1x128xf32>
      %174 = math.tanh %173 : vector<1x128xf32>
      %cst_76 = arith.constant 1.000000e+00 : f32
      %175 = vector.broadcast %cst_76 : f32 to vector<1x128xf32>
      %176 = arith.addf %175, %174 : vector<1x128xf32>
      %cst_77 = arith.constant 5.000000e-01 : f32
      %177 = vector.broadcast %cst_77 : f32 to vector<1x128xf32>
      %178 = arith.mulf %177, %176 : vector<1x128xf32>
      %179 = arith.mulf %166, %178 : vector<1x128xf32>
      %c0_78 = arith.constant 0 : index
      %c0_79 = arith.constant 0 : index
      %180 = vector.load %arg20[%c0_78, %c0_79] : memref<1x128xf32, #tpu.memory_space<vmem>>, vector<1x128xf32>
      %c0_80 = arith.constant 0 : index
      %c0_81 = arith.constant 0 : index
      %181 = vector.load %arg21[%c0_80, %c0_81] : memref<1x128xf32, #tpu.memory_space<vmem>>, vector<1x128xf32>
      %cst_82 = arith.constant dense<0.000000e+00> : vector<1xf32>
      %182 = vector.multi_reduction <add>, %179, %cst_82 [1] : vector<1x128xf32> to vector<1xf32>
      %183 = vector.shape_cast %182 : vector<1xf32> to vector<1x1xf32>
      %cst_83 = arith.constant 3.125000e-02 : f32
      %184 = vector.broadcast %cst_83 : f32 to vector<1x1xf32>
      %185 = arith.mulf %183, %184 : vector<1x1xf32>
      %186 = arith.mulf %179, %179 : vector<1x128xf32>
      %cst_84 = arith.constant dense<0.000000e+00> : vector<1xf32>
      %187 = vector.multi_reduction <add>, %186, %cst_84 [1] : vector<1x128xf32> to vector<1xf32>
      %188 = vector.shape_cast %187 : vector<1xf32> to vector<1x1xf32>
      %cst_85 = arith.constant 3.125000e-02 : f32
      %189 = vector.broadcast %cst_85 : f32 to vector<1x1xf32>
      %190 = arith.mulf %188, %189 : vector<1x1xf32>
      %191 = arith.mulf %185, %185 : vector<1x1xf32>
      %192 = arith.subf %190, %191 : vector<1x1xf32>
      %cst_86 = arith.constant 0.000000e+00 : f32
      %193 = vector.broadcast %cst_86 : f32 to vector<1x1xf32>
      %194 = arith.maximumf %192, %193 : vector<1x1xf32>
      %cst_87 = arith.constant 9.99999996E-13 : f32
      %195 = vector.broadcast %cst_87 : f32 to vector<1x1xf32>
      %196 = arith.addf %194, %195 : vector<1x1xf32>
      %197 = math.rsqrt %196 : vector<1x1xf32>
      %198 = vector.broadcast %185 : vector<1x1xf32> to vector<1x128xf32>
      %199 = arith.subf %179, %198 : vector<1x128xf32>
      %200 = vector.broadcast %197 : vector<1x1xf32> to vector<1x128xf32>
      %201 = arith.mulf %199, %200 : vector<1x128xf32>
      %202 = arith.mulf %201, %180 : vector<1x128xf32>
      %203 = arith.addf %202, %181 : vector<1x128xf32>
      %c0_88 = arith.constant 0 : index
      %c0_89 = arith.constant 0 : index
      %204 = vector.load %arg22[%c0_88, %c0_89] : memref<128x256xbf16, #tpu.memory_space<vmem>>, vector<128x256xbf16>
      %205 = arith.truncf %203 : vector<1x128xf32> to vector<1x128xbf16>
      %cst_90 = arith.constant dense<0.000000e+00> : vector<1x256xf32>
      %206 = tpu.matmul %205, %204, %cst_90 {dimension_numbers = #tpu.dot_dimension_numbers<[1], [0], [0], [1], [0, 0, 1, 1], [], []>} : vector<1x128xbf16>, vector<128x256xbf16>, vector<1x256xf32> -> vector<1x256xf32>
      %c0_91 = arith.constant 0 : index
      %c0_92 = arith.constant 0 : index
      %207 = vector.load %arg23[%c0_91, %c0_92] : memref<1x256xf32, #tpu.memory_space<vmem>>, vector<1x256xf32>
      %208 = arith.addf %206, %207 : vector<1x256xf32>
      %c0_93 = arith.constant 0 : index
      %c0_94 = arith.constant 0 : index
      %209 = vector.load %arg24[%c0_93, %c0_94] : memref<256x256xbf16, #tpu.memory_space<vmem>>, vector<256x256xbf16>
      %210 = arith.truncf %208 : vector<1x256xf32> to vector<1x256xbf16>
      %cst_95 = arith.constant dense<0.000000e+00> : vector<1x256xf32>
      %211 = tpu.matmul %210, %209, %cst_95 {dimension_numbers = #tpu.dot_dimension_numbers<[1], [0], [0], [1], [0, 0, 1, 1], [], []>} : vector<1x256xbf16>, vector<256x256xbf16>, vector<1x256xf32> -> vector<1x256xf32>
      %c0_96 = arith.constant 0 : index
      %c0_97 = arith.constant 0 : index
      %212 = vector.load %arg25[%c0_96, %c0_97] : memref<1x256xf32, #tpu.memory_space<vmem>>, vector<1x256xf32>
      %213 = arith.addf %211, %212 : vector<1x256xf32>
      %cst_98 = arith.constant 0.000000e+00 : f32
      %214 = vector.broadcast %cst_98 : f32 to vector<1x256xf32>
      %215 = arith.maximumf %213, %214 : vector<1x256xf32>
      %c0_99 = arith.constant 0 : index
      %c0_100 = arith.constant 0 : index
      %216 = vector.load %arg26[%c0_99, %c0_100] : memref<256x128xbf16, #tpu.memory_space<vmem>>, vector<256x128xbf16>
      %217 = arith.truncf %215 : vector<1x256xf32> to vector<1x256xbf16>
      %cst_101 = arith.constant dense<0.000000e+00> : vector<1x128xf32>
      %218 = tpu.matmul %217, %216, %cst_101 {dimension_numbers = #tpu.dot_dimension_numbers<[1], [0], [0], [1], [0, 0, 1, 1], [], []>} : vector<1x256xbf16>, vector<256x128xbf16>, vector<1x128xf32> -> vector<1x128xf32>
      %c0_102 = arith.constant 0 : index
      %c0_103 = arith.constant 0 : index
      %219 = vector.load %arg27[%c0_102, %c0_103] : memref<1x128xf32, #tpu.memory_space<vmem>>, vector<1x128xf32>
      %220 = arith.addf %218, %219 : vector<1x128xf32>
      %c0_104 = arith.constant 0 : index
      %c0_105 = arith.constant 0 : index
      %c0_106 = arith.constant 0 : index
      %221 = vector.load %arg28[%c0_104, %c0_105, %c0_106] : memref<1x1x128xf32, #tpu.memory_space<vmem>>, vector<1x1x128xf32>
      %222 = vector.shape_cast %221 : vector<1x1x128xf32> to vector<1x128xf32>
      %223 = vector.shape_cast %220 : vector<1x128xf32> to vector<1x1x128xf32>
      tpu.vector_store %arg28[%c0_104, %c0_105, %c0_106], %223 {strides = array<i32>} : memref<1x1x128xf32, #tpu.memory_space<vmem>>, vector<1x1x128xf32>,
    } else {
    }
    return
  }
  func.func @transform_0(%arg0: i32, %arg1: i32) -> (i32, i32, i32) {
    %c0_i32 = arith.constant 0 : i32
    %c0_i32_0 = arith.constant 0 : i32
    %c0_i32_1 = arith.constant 0 : i32
    return %arg0, %c0_i32, %c0_i32_0 : i32, i32, i32
  }
  func.func @transform_1(%arg0: i32, %arg1: i32) -> (i32, i32) {
    %c0_i32 = arith.constant 0 : i32
    %c0_i32_0 = arith.constant 0 : i32
    %c0_i32_1 = arith.constant 0 : i32
    return %c0_i32, %c0_i32_0 : i32, i32
  }
  func.func @transform_2(%arg0: i32, %arg1: i32) -> (i32, i32) {
    %c0_i32 = arith.constant 0 : i32
    %c0_i32_0 = arith.constant 0 : i32
    %c0_i32_1 = arith.constant 0 : i32
    return %c0_i32, %c0_i32_0 : i32, i32
  }
  func.func @transform_3(%arg0: i32, %arg1: i32) -> (i32, i32, i32) {
    %c0_i32 = arith.constant 0 : i32
    %c0_i32_0 = arith.constant 0 : i32
    %c0_i32_1 = arith.constant 0 : i32
    return %arg0, %c0_i32, %c0_i32_0 : i32, i32, i32
  }
  func.func @transform_4(%arg0: i32, %arg1: i32) -> (i32, i32, i32) {
    %c0_i32 = arith.constant 0 : i32
    %c0_i32_0 = arith.constant 0 : i32
    %c0_i32_1 = arith.constant 0 : i32
    return %arg1, %c0_i32, %c0_i32_0 : i32, i32, i32
  }
  func.func @transform_5(%arg0: i32, %arg1: i32) -> (i32, i32, i32) {
    %c0_i32 = arith.constant 0 : i32
    %c0_i32_0 = arith.constant 0 : i32
    %c0_i32_1 = arith.constant 0 : i32
    return %arg1, %c0_i32, %c0_i32_0 : i32, i32, i32
  }
  func.func @transform_6(%arg0: i32, %arg1: i32) -> (i32, i32, i32) {
    %c0_i32 = arith.constant 0 : i32
    %c0_i32_0 = arith.constant 0 : i32
    %c0_i32_1 = arith.constant 0 : i32
    return %arg1, %c0_i32, %c0_i32_0 : i32, i32, i32
  }
  func.func @transform_7(%arg0: i32, %arg1: i32) -> (i32, i32, i32) {
    %c0_i32 = arith.constant 0 : i32
    %c0_i32_0 = arith.constant 0 : i32
    %c0_i32_1 = arith.constant 0 : i32
    return %arg1, %c0_i32, %c0_i32_0 : i32, i32, i32
  }
  func.func @transform_8(%arg0: i32, %arg1: i32) -> (i32, i32, i32) {
    %c0_i32 = arith.constant 0 : i32
    %c0_i32_0 = arith.constant 0 : i32
    %c0_i32_1 = arith.constant 0 : i32
    return %arg1, %c0_i32, %c0_i32_0 : i32, i32, i32
  }
  func.func @transform_9(%arg0: i32, %arg1: i32) -> (i32, i32, i32) {
    %c0_i32 = arith.constant 0 : i32
    %c0_i32_0 = arith.constant 0 : i32
    %c0_i32_1 = arith.constant 0 : i32
    return %arg1, %c0_i32, %c0_i32_0 : i32, i32, i32
  }
  func.func @transform_10(%arg0: i32, %arg1: i32) -> (i32, i32, i32) {
    %c0_i32 = arith.constant 0 : i32
    %c0_i32_0 = arith.constant 0 : i32
    %c0_i32_1 = arith.constant 0 : i32
    return %arg1, %c0_i32, %c0_i32_0 : i32, i32, i32
  }
  func.func @transform_11(%arg0: i32, %arg1: i32) -> (i32, i32, i32) {
    %c0_i32 = arith.constant 0 : i32
    %c0_i32_0 = arith.constant 0 : i32
    %c0_i32_1 = arith.constant 0 : i32
    return %arg1, %c0_i32, %c0_i32_0 : i32, i32, i32
  }
  func.func @transform_12(%arg0: i32, %arg1: i32) -> (i32, i32, i32) {
    %c0_i32 = arith.constant 0 : i32
    %c0_i32_0 = arith.constant 0 : i32
    %c0_i32_1 = arith.constant 0 : i32
    return %arg1, %c0_i32, %c0_i32_0 : i32, i32, i32
  }
  func.func @transform_13(%arg0: i32, %arg1: i32) -> (i32, i32, i32) {
    %c0_i32 = arith.constant 0 : i32
    %c0_i32_0 = arith.constant 0 : i32
    %c0_i32_1 = arith.constant 0 : i32
    return %arg1, %c0_i32, %c0_i32_0 : i32, i32, i32
  }
  func.func @transform_14(%arg0: i32, %arg1: i32) -> (i32, i32, i32) {
    %c0_i32 = arith.constant 0 : i32
    %c0_i32_0 = arith.constant 0 : i32
    %c0_i32_1 = arith.constant 0 : i32
    return %arg1, %c0_i32, %c0_i32_0 : i32, i32, i32
  }
  func.func @transform_15(%arg0: i32, %arg1: i32) -> (i32, i32, i32) {
    %c0_i32 = arith.constant 0 : i32
    %c0_i32_0 = arith.constant 0 : i32
    %c0_i32_1 = arith.constant 0 : i32
    return %arg1, %c0_i32, %c0_i32_0 : i32, i32, i32
  }
  func.func @transform_16(%arg0: i32, %arg1: i32) -> (i32, i32) {
    %c0_i32 = arith.constant 0 : i32
    %c0_i32_0 = arith.constant 0 : i32
    %c0_i32_1 = arith.constant 0 : i32
    return %c0_i32, %c0_i32_0 : i32, i32
  }
  func.func @transform_17(%arg0: i32, %arg1: i32) -> (i32, i32) {
    %c0_i32 = arith.constant 0 : i32
    %c0_i32_0 = arith.constant 0 : i32
    %c0_i32_1 = arith.constant 0 : i32
    return %c0_i32, %c0_i32_0 : i32, i32
  }
  func.func @transform_18(%arg0: i32, %arg1: i32) -> (i32, i32) {
    %c0_i32 = arith.constant 0 : i32
    %c0_i32_0 = arith.constant 0 : i32
    %c0_i32_1 = arith.constant 0 : i32
    return %c0_i32, %c0_i32_0 : i32, i32
  }
  func.func @transform_19(%arg0: i32, %arg1: i32) -> (i32, i32) {
    %c0_i32 = arith.constant 0 : i32
    %c0_i32_0 = arith.constant 0 : i32
    %c0_i32_1 = arith.constant 0 : i32
    return %c0_i32, %c0_i32_0 : i32, i32
  }
  func.func @transform_20(%arg0: i32, %arg1: i32) -> (i32, i32) {
    %c0_i32 = arith.constant 0 : i32
    %c0_i32_0 = arith.constant 0 : i32
    %c0_i32_1 = arith.constant 0 : i32
    return %c0_i32, %c0_i32_0 : i32, i32
  }
  func.func @transform_21(%arg0: i32, %arg1: i32) -> (i32, i32) {
    %c0_i32 = arith.constant 0 : i32
    %c0_i32_0 = arith.constant 0 : i32
    %c0_i32_1 = arith.constant 0 : i32
    return %c0_i32, %c0_i32_0 : i32, i32
  }
  func.func @transform_22(%arg0: i32, %arg1: i32) -> (i32, i32) {
    %c0_i32 = arith.constant 0 : i32
    %c0_i32_0 = arith.constant 0 : i32
    %c0_i32_1 = arith.constant 0 : i32
    return %c0_i32, %c0_i32_0 : i32, i32
  }
  func.func @transform_23(%arg0: i32, %arg1: i32) -> (i32, i32) {
    %c0_i32 = arith.constant 0 : i32
    %c0_i32_0 = arith.constant 0 : i32
    %c0_i32_1 = arith.constant 0 : i32
    return %c0_i32, %c0_i32_0 : i32, i32
  }
  func.func @transform_24(%arg0: i32, %arg1: i32) -> (i32, i32) {
    %c0_i32 = arith.constant 0 : i32
    %c0_i32_0 = arith.constant 0 : i32
    %c0_i32_1 = arith.constant 0 : i32
    return %c0_i32, %c0_i32_0 : i32, i32
  }
  func.func @transform_25(%arg0: i32, %arg1: i32) -> (i32, i32) {
    %c0_i32 = arith.constant 0 : i32
    %c0_i32_0 = arith.constant 0 : i32
    %c0_i32_1 = arith.constant 0 : i32
    return %c0_i32, %c0_i32_0 : i32, i32
  }
  func.func @transform_26(%arg0: i32, %arg1: i32) -> (i32, i32, i32) {
    %c0_i32 = arith.constant 0 : i32
    %c0_i32_0 = arith.constant 0 : i32
    %c0_i32_1 = arith.constant 0 : i32
    return %arg0, %c0_i32, %c0_i32_0 : i32, i32, i32
  }
}

</mosaic_0001>

<bundles_post_ra>
// kernel: bert_class_forward.1
= control target key start
LH: loop header
LB: loop body
LE: loop exit
PB: predicated region body
PF: predicated region fallthrough
CT: control target
= control target key end

     0   :  { %s4683_s0 = inlined_call_operand.vmem [shape: f32[2,8,128], index: 0, kind: input, shape index: {}]   ;;  %s4684_s1 = inlined_call_operand.vmem [shape: f32[1,128], index: 1, kind: input, shape index: {}]   ;;  %s4685_s2 = inlined_call_operand.vmem [shape: f32[1,128], index: 2, kind: input, shape index: {}]   ;;  %s4686_s3 = inlined_call_operand.vmem [shape: f32[2,1,8], index: 3, kind: input, shape index: {}]   ;;  %s4687_s4 = inlined_call_operand.hbm [shape: bf16[2,128,384], index: 4, kind: input, shape index: {}]   ;;  %s4688_s5 = inlined_call_operand.vmem [shape: f32[2,1,384], index: 5, kind: input, shape index: {}]   ;;  %s4689_s6 = inlined_call_operand.vmem [shape: bf16[2,128,128], index: 6, kind: input, shape index: {}]   ;;  %s4690_s7 = inlined_call_operand.vmem [shape: f32[2,1,128], index: 7, kind: input, shape index: {}]   ;;  %s4691_s8 = inlined_call_operand.vmem [shape: f32[2,1,128], index: 8, kind: input, shape index: {}]   ;;  %s4692_s9 = inlined_call_operand.vmem [shape: f32[2,1,128], index: 9, kind: input, shape index: {}]   ;;  %s4693_s10 = inlined_call_operand.hbm [shape: bf16[2,128,128], index: 10, kind: input, shape index: {}]   ;;  %s4694_s11 = inlined_call_operand.vmem [shape: f32[2,1,128], index: 11, kind: input, shape index: {}]   ;;  %s4695_s12 = inlined_call_operand.hbm [shape: bf16[2,128,128], index: 12, kind: input, shape index: {}]   ;;  %s4696_s13 = inlined_call_operand.vmem [shape: f32[2,1,128], index: 13, kind: input, shape index: {}]   ;;  %s4697_s14 = inlined_call_operand.vmem [shape: f32[2,1,128], index: 14, kind: input, shape index: {}]   ;;  %s4698_s15 = inlined_call_operand.vmem [shape: f32[2,1,128], index: 15, kind: input, shape index: {}]   ;;  %s4699_s16 = inlined_call_operand.hbm [shape: bf16[128,128], index: 16, kind: input, shape index: {}]   ;;  %s4700_s17 = inlined_call_operand.vmem [shape: f32[1,128], index: 17, kind: input, shape index: {}]   ;;  %s4701_s18 = inlined_call_operand.vmem [shape: f32[1,128], index: 18, kind: input, shape index: {}]   ;;  %s4702_s19 = inlined_call_operand.vmem [shape: f32[1,128], index: 19, kind: input, shape index: {}]   ;;  %s4703_s20 = inlined_call_operand.hbm [shape: bf16[128,256], index: 20, kind: input, shape index: {}]   ;;  %s4704_s21 = inlined_call_operand.vmem [shape: f32[1,256], index: 21, kind: input, shape index: {}]   ;;  %s4705_s22 = inlined_call_operand.vmem [shape: bf16[256,256], index: 22, kind: input, shape index: {}]   ;;  %s4706_s23 = inlined_call_operand.vmem [shape: f32[1,256], index: 23, kind: input, shape index: {}]   ;;  %s4707_s24 = inlined_call_operand.hbm [shape: bf16[256,128], index: 24, kind: input, shape index: {}]   ;;  %s4708_s25 = inlined_call_operand.vmem [shape: f32[1,128], index: 25, kind: input, shape index: {}]   ;;  %s4709_s26 = inlined_call_operand.hbm [shape: f32[2,1,128], index: 26, kind: output, shape index: {}]  }
   0x1   :  { %4733 = sst [smem:[#allocation36_spill]] %s4683_s0 }
   0x2   :  { %4734 = sst [smem:[#allocation37_spill]] %s4684_s1 }
   0x3   :  { %4735 = sst [smem:[#allocation38_spill]] %s4685_s2 }
   0x4   :  { %4736 = sst [smem:[#allocation39_spill]] %s4686_s3 }
   0x5   :  { %4737 = sst [smem:[#allocation40_spill]] %s4687_s4 }
   0x6   :  { %4738 = sst [smem:[#allocation41_spill]] %s4688_s5 }
   0x7   :  { %4739 = sst [smem:[#allocation42_spill]] %s4689_s6 }
   0x8   :  { %4740 = sst [smem:[#allocation43_spill]] %s4690_s7 }
   0x9   :  { %4741 = sst [smem:[#allocation44_spill]] %s4691_s8 }
   0xa   :  { %4742 = sst [smem:[#allocation45_spill]] %s4692_s9 }
   0xb   :  { %4743 = sst [smem:[#allocation46_spill]] %s4693_s10 }
   0xc   :  { %4744 = sst [smem:[#allocation47_spill]] %s4694_s11 }
   0xd   :  { %4745 = sst [smem:[#allocation48_spill]] %s4695_s12 }
   0xe   :  { %4746 = sst [smem:[#allocation49_spill]] %s4696_s13 }
   0xf   :  { %4747 = sst [smem:[#allocation50_spill]] %s4697_s14 }
  0x10   :  { %4748 = sst [smem:[#allocation51_spill]] %s4698_s15 }
  0x11   :  { %4749 = sst [smem:[#allocation52_spill]] %s4699_s16 }
  0x12   :  { %4750 = sst [smem:[#allocation53_spill]] %s4700_s17 }
  0x13   :  { %4751 = sst [smem:[#allocation54_spill]] %s4701_s18 }
  0x14   :  { %4752 = sst [smem:[#allocation55_spill]] %s4702_s19 }
  0x15   :  { %4753 = sst [smem:[#allocation56_spill]] %s4703_s20 }
  0x16   :  { %4754 = sst [smem:[#allocation57_spill]] %s4704_s21 }
  0x17   :  { %4755 = sst [smem:[#allocation58_spill]] %s4705_s22 }
  0x18   :  { %4756 = sst [smem:[#allocation59_spill]] %s4706_s23 }
  0x19   :  { %4757 = sst [smem:[#allocation60_spill]] %s4707_s24 }
  0x1a   :  { %4758 = sst [smem:[#allocation61_spill]] %s4708_s25 }
  0x1b   :  { %4759 = sst [smem:[#allocation62_spill]] %s4709_s26 }
  0x1c   :  { %31 = vsyncpa [#allocation4], 0 }
  0x1d   :  { %33 = vsyncpa [#allocation4 + $0x1], 0 }
  0x1e   :  { %34 = vsyncpa [#allocation7], 0 }
  0x1f   :  { %36 = vsyncpa [#allocation7 + $0x1], 0 }
  0x20   :  { %37 = vsyncpa [#allocation10], 0 }
  0x21   :  { %38 = vsyncpa [#allocation13], 0 }
  0x22   :  { %39 = vsyncpa [#allocation5], 0 }
  0x23   :  { %41 = vsyncpa [#allocation5 + $0x1], 0  ;;  %s3987_s27 = smov 0   ;;  %s3989_s3 = smov 0  }
  0x24   :  { %s3991_s7 = smov 0   ;;  %s3993_s28 = smov 0  }
  0x25   :  { %s3995_s8 = smov 0   ;;  %s3997_s4 = smov 0  }
  0x26   :  { %s3999_s29 = smov 0   ;;  %s4001_s0 = smov 0  }
  0x27   :  { %s4003_s9 = smov 0   ;;  %s4005_s30 = smov 0  }
  0x28   :  { %s4007_s2 = smov 0  }
  0x29 LB: > { %4760 = sst [smem:[#allocation20_spill]] %s3800_s27  ;;  %s4041_s5 = sadd.s32 4294967295, %s3840_s2   ;;  %s3840_s2 = sphi %s4007_s2, %s47_s2   ;;  %s3836_s30 = sphi %s4005_s30, %s4846_s30   ;;  %s3832_s9 = sphi %s4003_s9, %s4845_s9   ;;  %s3828_s0 = sphi %s4001_s0, %s4844_s0   ;;  %s3824_s29 = sphi %s3999_s29, %s4843_s29   ;;  %s3820_s4 = sphi %s3997_s4, %s4842_s4   ;;  %s3816_s8 = sphi %s3995_s8, %s4841_s8   ;;  %s3812_s28 = sphi %s3993_s28, %s4840_s28   ;;  %s3808_s7 = sphi %s3991_s7, %s4839_s7   ;;  %s3804_s3 = sphi %s3989_s3, %s4848_s3   ;;  %s3800_s27 = sphi %s3987_s27, %s4847_s27  }
  0x2a   : > { %4761 = sst [smem:[#allocation21_spill]] %s3808_s7  ;;  %s2710_s10 = sadd.s32 4294967294, %s3840_s2  }
  0x2b   : > { %4762 = sst [smem:[#allocation22_spill]] %s3816_s8  ;;  %p173_p0 = scmp.ne.s32.totalorder %s3816_s8, %s3812_s28 }
  0x2c   : > { %4763 = sst [smem:[#allocation23_spill]] %s3820_s4  ;;  %p4717_p1 = scmp.eq.s32.totalorder %s4041_s5, 0 }
  0x2d   : > { %4764 = sst [smem:[#allocation24_spill]] %s3824_s29  ;;  %p692_p2 = scmp.ne.s32.totalorder %s3808_s7, %s3804_s3 }
  0x2e   : > { %4765 = sst [smem:[#allocation25_spill]] %s3828_s0  ;;  %p4051_p3 = por %p4717_p1, %p173_p0 }
  0x2f   : > { %4766 = sst [smem:[#allocation26_spill]] %s3832_s9  ;;  %p693_p4 = scmp.eq.s32.totalorder %s4041_s5, 3 }
  0x30   : > { %4767 = sst [smem:[#allocation27_spill]] %s3836_s30  ;;  %p698_p5 = scmp.ne.s32.totalorder %s3804_s3, %s3800_s27 }
  0x31   : > { %4768 = sst [smem:[#allocation28_spill]] %s3840_s2  ;;  %p699_p6 = scmp.eq.s32.totalorder %s2710_s10, 3 }
  0x32   : > { %p4058_p7 = por %p693_p4, %p692_p2  ;;  %p2711_p8 = scmp.ge.s32.totalorder %s3840_s2, 1 }
  0x33   : > { %p4063_p9 = por %p699_p6, %p698_p5  ;;  %p706_p10 = scmp.lt.s32.totalorder %s3840_s2, 5 }
  0x34   : > { %s4770_s26 = scalar_select %p4058_p7, 1, 0 }
  0x35   : > { %s4772_s28 = scalar_select %p4063_p9, 1, 0 }
  0x36   : > { %4771 = sst [smem:[#allocation29_spill]] %s4770_s26  ;;  %p4071_p11 = pnand %p2711_p8, %p706_p10 }
  0x37   : > { %4773 = sst [smem:[#allocation30_spill]] %s4772_s28  ;;  %s3842_s28 = smov [#allocation9]  }
  0x38   : > { %s4774_s16 = sld [smem:[#allocation52_spill]]  ;;  %p3366_p12 = pneg %p4071_p11 }
  0x39   : > { %s725_s26 = sshll.u32 %s3842_s28, 4  ;;  %s4715_s6 = smov 64   ;;  %s726_s26 = int_to_ptr.vmem [resolvable:$true] %s725_s26 }
  0x3a   : > { %p4079_p13 = pnand %p3366_p12, %p4717_p1  ;;  %s56_s23 = sadd.s32 1, %s3832_s9 }
  0x3b   : > { %p57_p0 = scmp.ge.s32.totalorder %s56_s23, 2  ;;  %s59_s28 = sadd.s32 1, %s3836_s30 }
  0x3c   : > { %s160_s21 = sadd.s32 1, %s3820_s4  ;;  %p167_p2 = scmp.ne.s32.totalorder %s3820_s4, %s3816_s8 }
  0x3d   : > { %s4850_s23 = smov (%p57_p0, %s56_s23), 0  ;;  %s4852_s28 = smov (!%p57_p0, %s59_s28), %s3836_s30 }
  0x3e   : > { %s723_s27 = sshll.u32 %s4774_s16, 4  ;;  %s4718_s16 = smov 4   ;;  %s724_s27 = int_to_ptr.hbm [resolvable:$true] %s723_s27 }
  0x3f   : > { %3369 = dma.hbm_to_vmem [thread:$0]  (!%p4079_p13), %s724_s27, 1024, %s726_s26, [#allocation10], %s4715_s6, %s4715_s6, %s4718_s16  }
  0x40   : > { %4777 = sst [smem:[#allocation31_spill]] %s4850_s23  ;;  %s157_s19 = ssub.s32 %s3832_s9, %s4850_s23 }
  0x41   : > { %p168_p4 = scmp.eq.s32.totalorder %s3840_s2, 0  ;;  %p61_p5 = scmp.ge.s32.totalorder %s4852_s28, 2 }
  0x42   : > { %p158_p6 = scmp.eq.s32.totalorder %s157_s19, 0  ;;  %p3393_p10 = scmp.lt.s32.totalorder %s3840_s2, 4 }
  0x43   : > { %p169_p8 = por %p168_p4, %p167_p2  ;;  %s4854_s28 = smov (%p61_p5, %s4852_s28), 0 }
  0x44   : > { %4778 = sst [smem:[#allocation32_spill]] %s4854_s28  ;;  %s679_s27 = ssub.s32 %s3836_s30, %s4854_s28 }
  0x45   : > { %s4103_s26 = scalar_select %p158_p6, %s3820_s4, %s160_s21  }
  0x46   : > { %s4108_s6 = sand.u32 1, %s3820_s4   ;;  %p680_p12 = scmp.eq.s32.totalorder %s679_s27, 0 }
  0x47   : > { %4779 = sst [smem:[#allocation33_spill]] %s4103_s26  ;;  %p4110_p1 = pnand %p3393_p10, %p169_p8 }
  0x48   : > { %s856_s23 = sand.u32 1, %s3840_s2   ;;  %s2717_s18 = sshll.u32 %s4108_s6, 6 }
  0x49   : > { %s4781_s19 = sadd.s32 1, %s3808_s7  ;;  %s3219_s17 = sshll.u32 %s3832_s9, 6 }
  0x4a   : > { %s4119_s22 = scalar_select %p680_p12, %s3808_s7, %s4781_s19  }
  0x4b   : > { %s4783_s21 = sld [smem:[#allocation46_spill]]  ;;  %s860_s28 = scalar_lea.vmem [#allocation6], %s2717_s18 }
  0x4c   : > { %4782 = sst [smem:[#allocation34_spill]] %s4119_s22  ;;  %s868_s30 = sshll.u32 %s860_s28, 4  ;;  %s869_s30 = int_to_ptr.vmem [resolvable:$true] %s868_s30 }
  0x4d   : > { %s4125_s27 = scalar_lea.sflag [#allocation7], %s856_s23  ;;  %s4784_s13 = smov 4  }
  0x4e   : > { %s4785_s2 = smov 64   ;;  %s4786_s12 = sld [smem:[#allocation48_spill]] }
  0x4f   : > { %s888_s14 = scalar_lea.vmem [#allocation8], %s2717_s18  ;;  %s4787_s20 = sld [smem:[#allocation56_spill]] }
  0x50   : > { %s896_s15 = sshll.u32 %s888_s14, 4  ;;  %s3845_s11 = smov [#allocation11]   ;;  %s4136_s15 = int_to_ptr.vmem [resolvable:$true] %s896_s15 }
  0x51   : > { %s865_s26 = scalar_lea.hbm %s4783_s21, %s3219_s17  ;;  %s748_s29 = sshll.u32 %s3845_s11, 4  ;;  %s749_s29 = int_to_ptr.vmem [resolvable:$true] %s748_s29 }
  0x52   : > { %s866_s4 = sshll.u32 %s865_s26, 4  ;;  %s4788_s24 = sld [smem:[#allocation60_spill]]  ;;  %s867_s4 = int_to_ptr.hbm [resolvable:$true] %s866_s4 }
  0x53   : > { %3382 = dma.hbm_to_vmem [thread:$0]  (!%p4110_p1), %s867_s4, 1024, %s869_s30, %s4125_s27, %s4785_s2, %s4785_s2, %s4784_s13  }
  0x54   : > { %s893_s7 = scalar_lea.hbm %s4786_s12, %s3219_s17  ;;  %s3846_s4 = smov 128  }
  0x55   : > { %s894_s21 = sshll.u32 %s893_s7, 4  ;;  %s746_s23 = sshll.u32 %s4787_s20, 4  ;;  %s747_s23 = int_to_ptr.hbm [resolvable:$true] %s746_s23  ;;  %s895_s21 = int_to_ptr.hbm [resolvable:$true] %s894_s21 }
  0x56   : > { %s3847_s30 = smov 8   ;;  %s3848_s7 = smov [#allocation12]  }
  0x57   : > { %3372 = dma.hbm_to_vmem [thread:$0]  (!%p4079_p13), %s747_s23, 2048, %s749_s29, [#allocation10], %s3846_s4, %s3846_s4, %s3847_s30  }
  0x58   : > { %s769_s22 = sshll.u32 %s4788_s24, 4  ;;  %s771_s19 = sshll.u32 %s3848_s7, 4  ;;  %s770_s22 = int_to_ptr.hbm [resolvable:$true] %s769_s22  ;;  %s772_s19 = int_to_ptr.vmem [resolvable:$true] %s771_s19 }
  0x59   : > { %3375 = dma.hbm_to_vmem [thread:$0]  (!%p4079_p13), %s770_s22, 2048, %s772_s19, [#allocation13], %s4785_s2, %s4785_s2, %s4784_s13  }
  0x5a   : > { %s3342_s11 = smul.u32 192, %s4108_s6  ;;  %s4789_s26 = sld [smem:[#allocation40_spill]] }
  0x5b   : > { %s3343_s29 = smul.u32 192, %s3832_s9  ;;  %s802_s18 = scalar_lea.sflag [#allocation4], %s4108_s6 }
  0x5c   : > { %s805_s4 = scalar_lea.vmem [#allocation3], %s3342_s11  ;;  %s3849_s7 = smov 192  }
  0x5d   : > { %s813_s30 = sshll.u32 %s805_s4, 4  ;;  %s3850_s12 = smov 12   ;;  %s814_s30 = int_to_ptr.vmem [resolvable:$true] %s813_s30 }
  0x5e   : > { %3385 = dma.hbm_to_vmem [thread:$0]  (!%p4110_p1), %s895_s21, 1024, %s4136_s15, %s4125_s27, %s4785_s2, %s4785_s2, %s4784_s13  }
  0x5f   : > { %926 = sbr.rel (%p4071_p11) target bundleno = 2510 (0x9ce), region = 124 }
  0x60   : > { %s810_s23 = scalar_lea.hbm %s4789_s26, %s3343_s29 }
  0x61   : > { %s811_s17 = sshll.u32 %s810_s23, 4  ;;  %s812_s17 = int_to_ptr.hbm [resolvable:$true] %s811_s17 }
  0x62   : > { %3379 = dma.hbm_to_vmem [thread:$0]  (!%p4110_p1), %s812_s17, 3072, %s814_s30, %s802_s18, %s3849_s7, %s3849_s7, %s3850_s12  }
  0x64   : > { %s928_s25 = sand.u32 1, %s3816_s8  }
  0x65   : > { %s3344_s22 = smul.u32 192, %s928_s25  ;;  %s929_s19 = scalar_lea.sflag [#allocation4], %s928_s25 }
  0x67   : > { %s4169_s11 = scalar_lea.vmem [#allocation3], %s3344_s22 }
  0x68   : > { %3779 = dma.done.wait (%p4051_p3), %s929_s19, 3072  }
  0x69   : > { %3781 = vsyncadd (%p4051_p3), %s929_s19, 4294964224  ;;  %s938_s12 = sand.u32 1, %s4041_s5   ;;  %s2724_s16 = sshll.u32 %s928_s25, 6 }
  0x6a   : > { %s939_s13 = scalar_lea.sflag [#allocation7], %s938_s12  ;;  %s4176_s2 = scalar_lea.vmem [#allocation6], %s2724_s16 }
  0x6b   : > { %3783 = dma.done.wait (%p4051_p3), %s939_s13, 2048  }
  0x6c   : > { %3785 = vsyncadd (%p4051_p3), %s939_s13, 4294965248  ;;  %s4182_s10 = scalar_lea.vmem [#allocation8], %s2724_s16  ;;  %p4791_p1 = scmp.eq.s32.totalorder %s4041_s5, 0 }
  0x6d   : > { %4790 = sst [smem:[#allocation35_spill]] %s4182_s10 }
  0x6e   : > { %3787 = dma.done.wait (%p4791_p1), [#allocation10], 3072   ;;  %p4792_p11 = pmov %p4791_p1 }
  0x6f   : > { %p4793_p13 = pmov %p4791_p1 }
  0x70   : > { %3789 = vsyncadd (%p4792_p11), [#allocation10], 4294964224 }
  0x71   : > { %3791 = dma.done.wait (%p4793_p13), [#allocation13], 2048   ;;  %p4794_p0 = pmov %p4791_p1 }
  0x72   : > { %s4795_s6 = sld [smem:[#allocation24_spill]]  ;;  %p1083_p3 = scmp.lt.s32.totalorder %s3828_s0, 1 }
  0x73   : > { %3793 = vsyncadd (%p4794_p0), [#allocation13], 4294965248  ;;  %s4797_s4 = sld [smem:[#allocation36_spill]]  ;;  %s4807_s26 = sand.u32 1, %s3804_s3  }
  0x74   : > { %s4196_s27 = scalar_select %p1083_p3, %s3828_s0, 1 }
  0x75   : > { %s4799_s13 = sld [smem:[#allocation41_spill]] }
  0x76   : > { %s2729_s5 = sshll.u32 %s4196_s27, 3  ;;  %s4800_s9 = sld [smem:[#allocation42_spill]] }
  0x77   : > { %s4802_s28 = sld [smem:[#allocation45_spill]] }
  0x78   : > { %p1090_p2 = scmp.lt.s32.totalorder %s4795_s6, 1  ;;  %s4803_s22 = sld [smem:[#allocation47_spill]] }
  0x79   : > { %s1086_s30 = scalar_lea.vmem %s4797_s4, %s2729_s5  ;;  %s4804_s16 = sld [smem:[#allocation49_spill]] }
  0x7a   : > { %s4199_s15 = scalar_select %p1090_p2, %s4795_s6, 1 }
  0x7b   : > { %s4805_s24 = sld [smem:[#allocation50_spill]]  ;;  %s4251_s5 = scalar_lea.vmem [#allocation14], %s4807_s26 }
  0x7c   : > { %s3345_s17 = smul.u32 3, %s4199_s15  ;;  %s3221_s18 = sshll.u32 %s4199_s15, 6 }
  0x7d   : > { %s4223_s21 = scalar_lea.vmem %s4800_s9, %s3221_s18  ;;  %s1107_s8 = scalar_lea.vmem %s4802_s28, %s4199_s15 }
  0x7e   : > { %s4218_s1 = scalar_lea.vmem %s4799_s13, %s3345_s17  ;;  %s1110_s19 = scalar_lea.vmem %s4803_s22, %s4199_s15 }
  0x7f   : > { %s1113_s13 = scalar_lea.vmem %s4804_s16, %s4199_s15  ;;  %s4806_s29 = sld [smem:[#allocation51_spill]] }
  0x80   : > { %p2732_p4 = scmp.ne.s32.totalorder %s4795_s6, 0 }
  0x81   : > { %s1116_s9 = scalar_lea.vmem %s4805_s24, %s4199_s15  ;;  %s4808_s6 = sld [smem:[#allocation37_spill]] (!%p2732_p4) }
  0x82   : > { %1124 = sbr.rel (%p2732_p4) target bundleno = 293 (0x125), region = 152  ;;  %s4809_s23 = sld [smem:[#allocation38_spill]] (!%p2732_p4) }
  0x85   : > { %s1119_s14 = scalar_lea.vmem %s4806_s29, %s4199_s15 }
  0x87   : > { %v1125_v0 = vld [vmem:[%s1086_s30] sm:$0xff] }
  0x88   : > { %1128 = vadd.xlane.f32.xlu0 %v1125_v0  ;;  %v1131_v1 = vmul.f32 %v1125_v0, %v1125_v0  ;;  %v3496_v17 = vld [vmem:[%s4808_s6] ss:$0 sm:$0xff] }
  0x89   : > { %v3497_v19 = vld [vmem:[%s4809_s23] ss:$0 sm:$0xff] }
  0x90   : > { %1132 = vadd.xlane.f32.xlu0 %v1131_v1 }
  0xfb   : > { %v1129_v2 = vpop.xlane.xlu0 %1128 }
  0xfc   : > { %v1130_v3 = vmul.f32 0.03125, %v1129_v2 }
  0xfe   : > { %v1135_v5 = vmul.f32 %v1130_v3, %v1130_v3  ;;  %v1149_v16 = vsub.f32 %v1125_v0, %v1130_v3 }
 0x103   : > { %v1133_v4 = vpop.xlane.xlu0 %1132 }
 0x104   : > { %v1134_v6 = vmul.f32 0.03125, %v1133_v4 }
 0x106   : > { %v1136_v7 = vsub.f32 %v1134_v6, %v1135_v5 }
 0x108   : > { %v1137_v8 = vmax.f32 %v1136_v7, 0.0 }
 0x10a   : > { %v1138_v9 = vadd.f32 1e-12, %v1137_v8 }
 0x10c   : > { %3498 = vrsqrt.f32 %v1138_v9  ;;  %vm1145_vm1 = vweird.f32 %v1138_v9 }
 0x112   : > { %v3499_v10 = vpop.eup %3498 }
 0x113   : > { %v1140_v11 = vmul.f32 %v3499_v10, %v1138_v9  ;;  %vm1146_vm0 = vweird.f32 %v3499_v10 }
 0x114   : > { %vm1147_vm2 = vmor %vm1145_vm1, %vm1146_vm0 }
 0x115   : > { %v1141_v12 = vmul.f32 %v3499_v10, %v1140_v11 }
 0x117   : > { %v1142_v13 = vmul.f32 0.5, %v1141_v12 }
 0x119   : > { %v1143_v14 = vsub.f32 1.5, %v1142_v13 }
 0x11b   : > { %v1144_v15 = vmul.f32 %v3499_v10, %v1143_v14 }
 0x11d   : > { %v1148_v18 = vsel %vm1147_vm2, %v3499_v10, %v1144_v15 }
 0x11e   : > { %v1150_v20 = vmul.f32 %v1149_v16, %v1148_v18 }
 0x120   : > { %v1154_v21 = vmul.f32 %v3496_v17, %v1150_v20 }
 0x122   : > { %v1158_v22 = vadd.f32 %v3497_v19, %v1154_v21 }
 0x124   : > { %1159 = vst [vmem:[#allocation2] sm:$0xff] %v1158_v22 }
 0x125 PF: > { %v2821_v23 = vld [vmem:[%s4169_s11 + $0xa8] sm:$0xf]  ;;  %v3244_v24 = vld [vmem:[%s4169_s11 + $0xb0] sm:$0xf0]  ;;  %v3243_v25 = vld [vmem:[%s4169_s11 + $0xac] sm:$0xf]  ;;  %v1161_v9 = vlaneseq }
 0x126   : > { %v2822_v26 = vor.u32 %v3244_v24, %v2821_v23  ;;  %v2823_v27 = vld [vmem:[%s4169_s11 + $0xb4] sm:$0xf0]  ;;  %v2809_v28 = vld [vmem:[%s4169_s11 + $0x90] sm:$0xf]  ;;  %v3241_v29 = vld [vmem:[%s4169_s11 + $0x98] sm:$0xf0] }
 0x127   : > { %v2826_v30 = vor.u32 %v3243_v25, %v2823_v27  ;;  %v3240_v31 = vld [vmem:[%s4169_s11 + $0x94] sm:$0xf]  ;;  %v2811_v32 = vld [vmem:[%s4169_s11 + $0x9c] sm:$0xf0]  ;;  %v2810_v33 = vor.u32 %v3241_v29, %v2809_v28  ;;  %v2797_v35 = vld [vmem:[%s4169_s11 + $0x78] sm:$0xf] }
 0x128   : > { %1342 = vmatpush.bf16.msra.mxu0 %v2822_v26  ;;  %v2814_v34 = vor.u32 %v3240_v31, %v2811_v32  ;;  %v3238_v36 = vld [vmem:[%s4169_s11 + $0x80] sm:$0xf0]  ;;  %v3237_v37 = vld [vmem:[%s4169_s11 + $0x7c] sm:$0xf]  ;;  %v2799_v38 = vld [vmem:[%s4169_s11 + $0x84] sm:$0xf0] }
 0x129   : > { %1355 = vmatpush.bf16.msra.mxu1 %v2826_v30  ;;  %v2798_v39 = vor.u32 %v3238_v36, %v2797_v35  ;;  %v2802_v40 = vor.u32 %v3237_v37, %v2799_v38  ;;  %v2785_v41 = vld [vmem:[%s4169_s11 + $0x60] sm:$0xf]  ;;  %v3235_v42 = vld [vmem:[%s4169_s11 + $0x68] sm:$0xf0]  ;;  %v3234_v43 = vld [vmem:[%s4169_s11 + $0x64] sm:$0xf] }
 0x12a   : > { %v2787_v44 = vld [vmem:[%s4169_s11 + $0x6c] sm:$0xf0]  ;;  %v2786_v45 = vor.u32 %v3235_v42, %v2785_v41  ;;  %v2773_v46 = vld [vmem:[%s4169_s11 + $0x48] sm:$0xf]  ;;  %v3232_v48 = vld [vmem:[%s4169_s11 + $0x50] sm:$0xf0] }
 0x12b   : > { %v2790_v47 = vor.u32 %v3234_v43, %v2787_v44  ;;  %v3231_v49 = vld [vmem:[%s4169_s11 + $0x4c] sm:$0xf]  ;;  %v2775_v50 = vld [vmem:[%s4169_s11 + $0x54] sm:$0xf0]  ;;  %v2774_v51 = vor.u32 %v3232_v48, %v2773_v46  ;;  %v2761_v53 = vld [vmem:[%s4169_s11 + $0x30] sm:$0xf] }
 0x12c   : > { %1343 = vmatpush.bf16.msra.mxu0 %v2810_v33  ;;  %v2778_v52 = vor.u32 %v3231_v49, %v2775_v50  ;;  %v3229_v54 = vld [vmem:[%s4169_s11 + $0x38] sm:$0xf0]  ;;  %v3228_v55 = vld [vmem:[%s4169_s11 + $0x34] sm:$0xf]  ;;  %v2763_v56 = vld [vmem:[%s4169_s11 + $0x3c] sm:$0xf0] }
 0x12d   : > { %1356 = vmatpush.bf16.msra.mxu1 %v2814_v34  ;;  %v2762_v57 = vor.u32 %v3229_v54, %v2761_v53  ;;  %v2766_v58 = vor.u32 %v3228_v55, %v2763_v56  ;;  %v2749_v59 = vld [vmem:[%s4169_s11 + $0x18] sm:$0xf]  ;;  %v3226_v60 = vld [vmem:[%s4169_s11 + $0x20] sm:$0xf0]  ;;  %v3225_v61 = vld [vmem:[%s4169_s11 + $0x1c] sm:$0xf] }
 0x12e   : > { %v2751_v62 = vld [vmem:[%s4169_s11 + $0x24] sm:$0xf0]  ;;  %v2750_v63 = vor.u32 %v3226_v60, %v2749_v59  ;;  %v2737_v1 = vld [vmem:[%s4169_s11] sm:$0xf]  ;;  %v3223_v2 = vld [vmem:[%s4169_s11 + $0x8] sm:$0xf0] }
 0x12f   : > { %v2754_v0 = vor.u32 %v3225_v61, %v2751_v62  ;;  %v3222_v3 = vld [vmem:[%s4169_s11 + $0x4] sm:$0xf]  ;;  %v2739_v4 = vld [vmem:[%s4169_s11 + $0xc] sm:$0xf0]  ;;  %v2738_v5 = vor.u32 %v3223_v2, %v2737_v1  ;;  %v4292_v6 = vld [vmem:[#allocation2] sm:$0xff]  ;;  %v1162_v10 = vand.u32 127, %v1161_v9 }
 0x130   : > { %1344 = vmatpush.bf16.msra.mxu0 %v2798_v39  ;;  %v2742_v7 = vor.u32 %v3222_v3, %v2739_v4  ;;  %v4296_v8 = vpack.c.bf16 %v4292_v6, %v4292_v6  ;;  %v4301_v11 = vld [vmem:[%s4218_s1] sm:$0x7]  ;;  %v3851_v17 = vmov 0.0   ;;  %v2829_v27 = vld [vmem:[%s4169_s11 + $0xb0] sm:$0xf]  ;;  %s4810_s7 = sld [smem:[#allocation39_spill]] }
 0x131   : > { %1357 = vmatpush.bf16.msra.mxu1 %v2802_v40  ;;  %vm1168_vm3 = vcmp.ge.s32.totalorder %v1162_v10, 16  ;;  %vm1169_vm4 = vcmp.lt.s32.totalorder %v1162_v10, 32  ;;  %v1208_v12 = vperm.slane %v4301_v11, 0  ;;  %v1209_v13 = vperm.slane %v4301_v11, 1  ;;  %v3245_v28 = vld [vmem:[%s4169_s11 + $0xb8] sm:$0xf0] }
 0x132   : > { %vm1164_vm5 = vcmp.lt.s32.totalorder %v1162_v10, 16  ;;  %vm1170_vm6 = vmand %vm1168_vm3, %vm1169_vm4  ;;  %v2817_v29 = vld [vmem:[%s4169_s11 + $0x98] sm:$0xf]  ;;  %v2830_v30 = vor.u32 %v3245_v28, %v2829_v27  ;;  %v3242_v31 = vld [vmem:[%s4169_s11 + $0xa0] sm:$0xf0]  ;;  %vm1404_vm7 = vcmask 64512  }
 0x133   : > { %v4305_v18 = vsel %vm1164_vm5, 1.0, %v3851_v17  ;;  %v4307_v19 = vsel %vm1170_vm6, 1.0, %v3851_v17  ;;  %v2818_v32 = vor.u32 %v3242_v31, %v2817_v29  ;;  %v2805_v33 = vld [vmem:[%s4169_s11 + $0x80] sm:$0xf]  ;;  %v3239_v34 = vld [vmem:[%s4169_s11 + $0x88] sm:$0xf0] }
 0x134   : > { %1345 = vmatpush.bf16.msra.mxu0 %v2786_v45  ;;  %1368 = vmatpush.bf16.msra.mxu2 %v2830_v30  ;;  %v2806_v35 = vor.u32 %v3239_v34, %v2805_v33  ;;  %v2793_v36 = vld [vmem:[%s4169_s11 + $0x68] sm:$0xf]  ;;  %v3236_v37 = vld [vmem:[%s4169_s11 + $0x70] sm:$0xf0]  ;;  %v2781_v39 = vld [vmem:[%s4169_s11 + $0x50] sm:$0xf] }
 0x135   : > { %1358 = vmatpush.bf16.msra.mxu1 %v2790_v47  ;;  %v2794_v38 = vor.u32 %v3236_v37, %v2793_v36  ;;  %v3233_v40 = vld [vmem:[%s4169_s11 + $0x58] sm:$0xf0]  ;;  %v2769_v42 = vld [vmem:[%s4169_s11 + $0x38] sm:$0xf]  ;;  %v3230_v43 = vld [vmem:[%s4169_s11 + $0x40] sm:$0xf0] }
 0x136   : > { %v2782_v41 = vor.u32 %v3233_v40, %v2781_v39  ;;  %s4811_s25 = scalar_lea.vmem %s4810_s7, %s4196_s27  ;;  %v2770_v45 = vor.u32 %v3230_v43, %v2769_v42  ;;  %v2757_v47 = vld [vmem:[%s4169_s11 + $0x20] sm:$0xf]  ;;  %v3227_v48 = vld [vmem:[%s4169_s11 + $0x28] sm:$0xf0]  ;;  %v3224_v53 = vld [vmem:[%s4169_s11 + $0x10] sm:$0xf0] }
 0x137   : > { %v3500_v44 = vld [vmem:[%s4811_s25] ss:$0 sm:$0xff]  ;;  %vm1431_vm8 = vcmask 1043456   ;;  %s4812_s22 = sld [smem:[#allocation43_spill]]  ;;  %v3260_v39 = vld [vmem:[%s4176_s2 + $0x30] sm:$0xff]  ;;  %v3259_v40 = vld [vmem:[%s4176_s2 + $0x28] sm:$0xff] }
 0x138   : > { %1346 = vmatpush.bf16.msra.mxu0 %v2774_v51  ;;  %1369 = vmatpush.bf16.msra.mxu2 %v2818_v32  ;;  %v2758_v51 = vor.u32 %v3227_v48, %v2757_v47  ;;  %v3246_v27 = vld [vmem:[%s4223_s21] sm:$0xff]  ;;  %v3256_v43 = vld [vmem:[%s4176_s2 + $0x10] sm:$0xff]  ;;  %s4815_s16 = sld [smem:[#allocation44_spill]] }
 0x139   : > { %1359 = vmatpush.bf16.msra.mxu1 %v2778_v52  ;;  %v2745_v52 = vld [vmem:[%s4169_s11 + $0x8] sm:$0xf]  ;;  %v3257_v42 = vld [vmem:[%s4176_s2 + $0x18] sm:$0xff]  ;;  %s4822_s7 = sld [smem:[#allocation24_spill]] }
 0x13a   : > { %v2746_v54 = vor.u32 %v3224_v53, %v2745_v52 }
 0x13c   : > { %1347 = vmatpush.bf16.msra.mxu0 %v2762_v57  ;;  %1370 = vmatpush.bf16.msra.mxu2 %v2806_v35 }
 0x13d   : > { %1360 = vmatpush.bf16.msra.mxu1 %v2766_v58  ;;  %s4813_s12 = scalar_lea.vmem %s4812_s22, %s4199_s15 }
 0x13e   : > { %v3501_v34 = vld [vmem:[%s4813_s12] ss:$0 sm:$0xff]  ;;  %s4816_s20 = scalar_lea.vmem %s4815_s16, %s4199_s15 }
 0x13f   : > { %p2928_p5 = scmp.ne.s32.totalorder %s4822_s7, 1 }
 0x140   : > { %1348 = vmatpush.bf16.msra.mxu0 %v2750_v63  ;;  %1371 = vmatpush.bf16.msra.mxu2 %v2794_v38  ;;  %v3261_v38 = vld [vmem:[%s4176_s2 + $0x38] sm:$0xff]  ;;  %s4824_s27 = sld [smem:[#allocation58_spill]] (!%p2928_p5) }
 0x141   : > { %1361 = vmatpush.bf16.msra.mxu1 %v2754_v0  ;;  %s4826_s10 = sld [smem:[#allocation54_spill]] (!%p2928_p5) }
 0x142   : > { %s4828_s15 = sld [smem:[#allocation57_spill]] (!%p2928_p5) }
 0x143   : > { %s4829_s25 = sld [smem:[#allocation59_spill]] (!%p2928_p5) }
 0x144   : > { %1349 = vmatpush.bf16.msra.mxu0 %v2738_v5  ;;  %1372 = vmatpush.bf16.msra.mxu2 %v2782_v41  ;;  %v3258_v41 = vld [vmem:[%s4176_s2 + $0x20] sm:$0xff]  ;;  %s4830_s12 = sld [smem:[#allocation61_spill]] (!%p2928_p5) }
 0x145   : > { %1362 = vmatpush.bf16.msra.mxu1 %v2742_v7  ;;  %v1210_v7 = vperm.slane %v4301_v11, 2 }
 0x146   : > { %s4825_s22 = smov (!%p2928_p5), %s4824_s27 }
 0x147   : > { %1350 = vmatmul.bf16.vlgmr.msra.gmra.mxu0 %v4296_v8 }
 0x148   : > { %1363 = vmatmul.bf16.vlgmr.msra.gmra.mxu1 %v4296_v8  ;;  %1373 = vmatpush.bf16.msra.mxu2 %v2770_v45  ;;  %v3254_v45 = vld [vmem:[%s4176_s2] sm:$0xff] }
 0x149   : > { %1637 = vmatpush.bf16.msrb.mxu0 %v3261_v38 }
 0x14c   : > { %1374 = vmatpush.bf16.msra.mxu2 %v2758_v51 }
 0x14d   : > { %1638 = vmatpush.bf16.msrb.mxu0 %v3260_v39 }
 0x150   : > { %1375 = vmatpush.bf16.msra.mxu2 %v2746_v54 }
 0x151   : > { %1639 = vmatpush.bf16.msrb.mxu0 %v3259_v40 }
 0x153   : > { %1376 = vmatmul.bf16.vlgmr.msra.gmra.mxu2 %v4296_v8 }
 0x155   : > { %1640 = vmatpush.bf16.msrb.mxu0 %v3258_v41 }
 0x159   : > { %1641 = vmatpush.bf16.msrb.mxu0 %v3257_v42 }
 0x15d   : > { %1642 = vmatpush.bf16.msrb.mxu0 %v3256_v43 }
 0x1c4   : > { %v1351_v14 = vpop.f32.mrf.mxu0 }
 0x1c5   : > { %v1352_v15 = vadd.f32 %v1351_v14, %v1208_v12  ;;  %v1364_v16 = vpop.f32.mrf.mxu1  ;;  %v3253_v12 = vld [vmem:[%s4223_s21 + $0x38] sm:$0xff]  ;;  %v3251_v14 = vld [vmem:[%s4223_s21 + $0x28] sm:$0xff] }
 0x1c6   : > { %v1365_v20 = vadd.f32 %v1364_v16, %v1209_v13  ;;  %v3252_v13 = vld [vmem:[%s4223_s21 + $0x30] sm:$0xff] }
 0x1c7   : > { %v1383_v22 = vmul.f32 %v4305_v18, %v1352_v15  ;;  %v1384_v23 = vmul.f32 %v4307_v19, %v1352_v15  ;;  %v3250_v15 = vld [vmem:[%s4223_s21 + $0x20] sm:$0xff] }
 0x1c8   : > { %v1381_v21 = vpack.c.bf16 %v1365_v20, %v1365_v20 }
 0x1c9   : > { %v1385_v26 = vpack.c.bf16 %v1384_v23, %v1383_v22 }
 0x1ca   : > { %1397 = vmatpush.bf16.xpose.msra.mxu3 %v1381_v21 }
 0x1cc   : > { %v1353_v24 = vpop.f32.mrf.mxu0 }
 0x1cd   : > { %v1366_v25 = vpop.f32.mrf.mxu1  ;;  %v3249_v24 = vld [vmem:[%s4223_s21 + $0x18] sm:$0xff] }
 0x1ce   : > { %v3248_v25 = vld [vmem:[%s4223_s21 + $0x10] sm:$0xff] }
 0x1d1   : > { %1398 = vmatmul.bf16.vlgmr.msra.gmra.mxu3 %v1385_v26  ;;  %v3247_v26 = vld [vmem:[%s4223_s21 + $0x8] sm:$0xff]  ;;  %s4814_s21 = sld [smem:[#allocation35_spill]] }
 0x1d6   : > { %v1377_v4 = vpop.f32.mrf.mxu2 }
 0x1d7   : > { %v1378_v8 = vadd.f32 %v1377_v4, %v1210_v7  ;;  %v3269_v51 = vld [vmem:[%s4814_s21 + $0x38] sm:$0xff]  ;;  %v3268_v4 = vld [vmem:[%s4814_s21 + $0x30] sm:$0xff]  ;;  %v3266_v7 = vld [vmem:[%s4814_s21 + $0x20] sm:$0xff] }
 0x1d8   : > { %1728 = vmatpush.bf16.msrb.mxu1 %v3269_v51 }
 0x1d9   : > { %v1382_v9 = vpack.c.bf16 %v1378_v8, %v1378_v8  ;;  %v3265_v8 = vld [vmem:[%s4814_s21 + $0x18] sm:$0xff] }
 0x1db   : > { %v1433_v10 = vsel %vm1431_vm8, %v1382_v9, 0  ;;  %v3264_v9 = vld [vmem:[%s4814_s21 + $0x10] sm:$0xff] }
 0x1dc   : > { %1442 = vmatpush.bf16.msrb.mxu3 %v1433_v10  ;;  %1729 = vmatpush.bf16.msrb.mxu1 %v3268_v4  ;;  %v3263_v10 = vld [vmem:[%s4814_s21 + $0x8] sm:$0xff] }
 0x1de   : > { %v1379_v5 = vpop.f32.mrf.mxu2 }
 0x1df   : > { %v3267_v5 = vld [vmem:[%s4814_s21 + $0x28] sm:$0xff] }
 0x1e0   : > { %1521 = vmatpush.bf16.msra.mxu3 %v3253_v12  ;;  %1730 = vmatpush.bf16.msrb.mxu1 %v3267_v5  ;;  %v3262_v12 = vld [vmem:[%s4814_s21] sm:$0xff] }
 0x1e4   : > { %1522 = vmatpush.bf16.msra.mxu3 %v3252_v13  ;;  %1731 = vmatpush.bf16.msrb.mxu1 %v3266_v7  ;;  %v3504_v13 = vld [vmem:[%s1110_s19] ss:$0 sm:$0xff]  ;;  %s4827_s19 = sld [smem:[#allocation55_spill]] (!%p2928_p5) }
 0x1e8   : > { %1523 = vmatpush.bf16.msra.mxu3 %v3251_v14  ;;  %1732 = vmatpush.bf16.msrb.mxu1 %v3265_v8 }
 0x1ec   : > { %1524 = vmatpush.bf16.msra.mxu3 %v3250_v15  ;;  %1733 = vmatpush.bf16.msrb.mxu1 %v3264_v9 }
 0x1f0   : > { %1525 = vmatpush.bf16.msra.mxu3 %v3249_v24  ;;  %1734 = vmatpush.bf16.msrb.mxu1 %v3263_v10 }
 0x1f4   : > { %1526 = vmatpush.bf16.msra.mxu3 %v3248_v25  ;;  %1735 = vmatpush.bf16.msrb.mxu1 %v3262_v12 }
 0x1f8   : > { %1527 = vmatpush.bf16.msra.mxu3 %v3247_v26 }
 0x1fc   : > { %1528 = vmatpush.bf16.msra.mxu3 %v3246_v27 }
 0x254   : > { %v1399_v46 = vpop.f32.mrf.mxu3 }
 0x255   : > { %v1400_v49 = vadd.f32 %v3500_v44, %v1399_v46 }
 0x257   : > { %v1405_v50 = vsel %vm1404_vm7, %v1400_v49, -inf }
 0x258   : > { %1406 = vmax.xlane.f32.xlu0 %v1405_v50 }
 0x25c   : > { %v1401_v55 = vpop.f32.mrf.mxu3 }
 0x25d   : > { %v1402_v56 = vadd.f32 %v3500_v44, %v1401_v55 }
 0x25f   : > { %v1408_v57 = vsel %vm1404_vm7, %v1402_v56, -inf }
 0x260   : > { %1409 = vmax.xlane.f32.xlu0 %v1408_v57 }
 0x2cb   : > { %v1407_v58 = vpop.xlane.xlu0 %1406 }
 0x2cc   : > { %v1411_v59 = vsub.f32 %v1400_v49, %v1407_v58 }
 0x2ce   : > { %v1413_v60 = vmul.f32 1.442695, %v1411_v59 }
 0x2d0   : > { %3508 = vpow2.f32 %v1413_v60 }
 0x2d3   : > { %v1410_v61 = vpop.xlane.xlu0 %1409 }
 0x2d4   : > { %v1412_v62 = vsub.f32 %v1402_v56, %v1410_v61  ;;  %v3502_v61 = vld [vmem:[%s4816_s20] ss:$0 sm:$0xff] }
 0x2d6   : > { %v3509_v63 = vpop.eup %3508  ;;  %v1415_v0 = vmul.f32 1.442695, %v1412_v62 }
 0x2d7   : > { %v1417_v1 = vsel %vm1404_vm7, %v3509_v63, 0.0 }
 0x2d8   : > { %3510 = vpow2.f32 %v1415_v0  ;;  %1418 = vadd.xlane.f32.xlu1 %v1417_v1  ;;  %v3503_v0 = vld [vmem:[%s1107_s8] ss:$0 sm:$0xff] }
 0x2de   : > { %v3511_v2 = vpop.eup %3510 }
 0x2df   : > { %v1420_v3 = vsel %vm1404_vm7, %v3511_v2, 0.0 }
 0x2e0   : > { %1421 = vadd.xlane.f32.xlu1 %v1420_v3 }
 0x34b   : > { %v1419_v16 = vpop.xlane.xlu1 %1418 }
 0x34c   : > { %3512 = vrcp.f32 %v1419_v16 }
 0x352   : > { %v3513_v17 = vpop.eup %3512 }
 0x353   : > { %v1422_v11 = vpop.xlane.xlu1 %1421  ;;  %v1425_v21 = vmul.f32 %v3513_v17, %v3509_v63 }
 0x354   : > { %3514 = vrcp.f32 %v1422_v11 }
 0x35a   : > { %v3515_v20 = vpop.eup %3514 }
 0x35b   : > { %v1426_v22 = vmul.f32 %v3515_v20, %v3511_v2 }
 0x35d   : > { %v1427_v23 = vpack.c.bf16 %v1426_v22, %v1425_v21 }
 0x35f   : > { %2831 = vmatmul.msk.bf16.vlgmr.msrb.gmra.mxu3 %vm1404_vm7, %v1427_v23 }
 0x3e2   : > { %v1444_v28 = vpop.f32.mrf.mxu3 }
 0x3e3   : > { %v1449_v30 = vmul.f32 %v4305_v18, %v1444_v28  ;;  %v3505_v28 = vld [vmem:[%s1113_s13] ss:$0 sm:$0xff] }
 0x3ea   : > { %v1446_v29 = vpop.f32.mrf.mxu3 }
 0x3eb   : > { %v1450_v31 = vmul.f32 %v4307_v19, %v1446_v29 }
 0x3ed   : > { %v1451_v32 = vadd.f32 %v1450_v31, %v1449_v30 }
 0x3ef   : > { %v1468_v33 = vpack.c.bf16 %v1451_v32, %v1451_v32 }
 0x3f1   : > { %1529 = vmatmul.bf16.vlgmr.msra.gmra.mxu3 %v1468_v33 }
 0x474   : > { %v1530_v35 = vpop.f32.mrf.mxu3 }
 0x475   : > { %v1531_v36 = vadd.f32 %v3501_v34, %v1530_v35 }
 0x477   : > { %v1534_v37 = vadd.f32 %v1531_v36, %v4292_v6  ;;  %v3255_v6 = vld [vmem:[%s4176_s2 + $0x8] sm:$0xff] }
 0x478   : > { %1643 = vmatpush.bf16.msrb.mxu0 %v3255_v6 }
 0x479   : > { %1537 = vadd.xlane.f32.xlu2 %v1534_v37  ;;  %v1540_v19 = vmul.f32 %v1534_v37, %v1534_v37 }
 0x47c   : > { %v1532_v18 = vpop.f32.mrf.mxu3  ;;  %1644 = vmatpush.bf16.msrb.mxu0 %v3254_v45 }
 0x481   : > { %1541 = vadd.xlane.f32.xlu2 %v1540_v19 }
 0x4ec   : > { %v1538_v44 = vpop.xlane.xlu2 %1537 }
 0x4ed   : > { %v1539_v46 = vmul.f32 0.03125, %v1538_v44 }
 0x4ef   : > { %v1544_v48 = vmul.f32 %v1539_v46, %v1539_v46  ;;  %v1558_v60 = vsub.f32 %v1534_v37, %v1539_v46  ;;  %v3506_v46 = vld [vmem:[%s1116_s9] ss:$0 sm:$0xff] }
 0x4f4   : > { %v1542_v47 = vpop.xlane.xlu2 %1541 }
 0x4f5   : > { %v1543_v49 = vmul.f32 0.03125, %v1542_v47 }
 0x4f7   : > { %v1545_v50 = vsub.f32 %v1543_v49, %v1544_v48  ;;  %v3507_v48 = vld [vmem:[%s1119_s14] ss:$0 sm:$0xff]  ;;  %s4823_s14 = sld [smem:[#allocation53_spill]] (!%p2928_p5) }
 0x4f9   : > { %v1546_v52 = vmax.f32 %v1545_v50, 0.0 }
 0x4fb   : > { %v1547_v53 = vadd.f32 1e-12, %v1546_v52 }
 0x4fd   : > { %3516 = vrsqrt.f32 %v1547_v53  ;;  %vm1554_vm10 = vweird.f32 %v1547_v53 }
 0x503   : > { %v3517_v54 = vpop.eup %3516 }
 0x504   : > { %v1549_v55 = vmul.f32 %v3517_v54, %v1547_v53  ;;  %vm1555_vm9 = vweird.f32 %v3517_v54 }
 0x505   : > { %vm1556_vm11 = vmor %vm1554_vm10, %vm1555_vm9 }
 0x506   : > { %v1550_v56 = vmul.f32 %v3517_v54, %v1549_v55 }
 0x508   : > { %v1551_v57 = vmul.f32 0.5, %v1550_v56 }
 0x50a   : > { %v1552_v58 = vsub.f32 1.5, %v1551_v57 }
 0x50c   : > { %v1553_v59 = vmul.f32 %v3517_v54, %v1552_v58 }
 0x50e   : > { %v1557_v62 = vsel %vm1556_vm11, %v3517_v54, %v1553_v59 }
 0x50f   : > { %v1559_v63 = vmul.f32 %v1558_v60, %v1557_v62 }
 0x511   : > { %v1563_v1 = vmul.f32 %v3502_v61, %v1559_v63 }
 0x513   : > { %v1567_v2 = vadd.f32 %v3503_v0, %v1563_v1 }
 0x515   : > { %v1584_v3 = vpack.c.bf16 %v1567_v2, %v1567_v2 }
 0x517   : > { %1645 = vmatmul.bf16.vlgmr.msrb.gmra.mxu0 %v1584_v3 }
 0x594   : > { %v1646_v14 = vpop.f32.mrf.mxu0 }
 0x595   : > { %v1647_v15 = vadd.f32 %v3504_v13, %v1646_v14 }
 0x597   : > { %v1650_v16 = vmul.f32 %v1647_v15, %v1647_v15 }
 0x599   : > { %v1651_v11 = vmul.f32 %v1650_v16, %v1647_v15 }
 0x59b   : > { %v1652_v17 = vmul.f32 0.044715, %v1651_v11 }
 0x59c   : > { %v1648_v20 = vpop.f32.mrf.mxu0 }
 0x59d   : > { %v1653_v21 = vadd.f32 %v1652_v17, %v1647_v15 }
 0x59f   : > { %v1654_v22 = vmul.f32 0.7978846, %v1653_v21 }
 0x5a1   : > { %3518 = vtanh.f32 %v1654_v22 }
 0x5a7   : > { %v3519_v23 = vpop.eup %3518 }
 0x5a8   : > { %v1656_v24 = vadd.f32 1.0, %v3519_v23 }
 0x5aa   : > { %v1657_v25 = vmul.f32 0.5, %v1656_v24 }
 0x5ac   : > { %v1658_v26 = vmul.f32 %v1657_v25, %v1647_v15 }
 0x5ae   : > { %v1675_v27 = vpack.c.bf16 %v1658_v26, %v1658_v26 }
 0x5b0   : > { %1736 = vmatmul.bf16.vlgmr.msrb.gmra.mxu1 %v1675_v27 }
 0x62d   : > { %v1737_v29 = vpop.f32.mrf.mxu1 }
 0x62e   : > { %v1738_v30 = vadd.f32 %v3505_v28, %v1737_v29 }
 0x630   : > { %v1741_v31 = vadd.f32 %v1738_v30, %v1567_v2 }
 0x632   : > { %1744 = vadd.xlane.f32.xlu0 %v1741_v31  ;;  %v1747_v32 = vmul.f32 %v1741_v31, %v1741_v31 }
 0x634   : > { %1748 = vadd.xlane.f32.xlu1 %v1747_v32 }
 0x635   : > { %v1739_v33 = vpop.f32.mrf.mxu1 }
 0x6a5   : > { %v1745_v34 = vpop.xlane.xlu0 %1744 }
 0x6a6   : > { %v1746_v35 = vmul.f32 0.03125, %v1745_v34 }
 0x6a7   : > { %v1749_v36 = vpop.xlane.xlu1 %1748 }
 0x6a8   : > { %v1751_v37 = vmul.f32 %v1746_v35, %v1746_v35  ;;  %v1750_v18 = vmul.f32 0.03125, %v1749_v36  ;;  %v1765_v45 = vsub.f32 %v1741_v31, %v1746_v35 }
 0x6aa   : > { %v1752_v19 = vsub.f32 %v1750_v18, %v1751_v37 }
 0x6ac   : > { %v1753_v38 = vmax.f32 %v1752_v19, 0.0 }
 0x6ae   : > { %v1754_v39 = vadd.f32 1e-12, %v1753_v38 }
 0x6b0   : > { %3520 = vrsqrt.f32 %v1754_v39  ;;  %vm1761_vm13 = vweird.f32 %v1754_v39 }
 0x6b6   : > { %v3521_v40 = vpop.eup %3520 }
 0x6b7   : > { %v1756_v41 = vmul.f32 %v3521_v40, %v1754_v39  ;;  %vm1762_vm12 = vweird.f32 %v3521_v40 }
 0x6b8   : > { %vm1763_vm14 = vmor %vm1761_vm13, %vm1762_vm12 }
 0x6b9   : > { %v1757_v42 = vmul.f32 %v3521_v40, %v1756_v41 }
 0x6bb   : > { %v1758_v43 = vmul.f32 0.5, %v1757_v42 }
 0x6bd   : > { %v1759_v44 = vsub.f32 1.5, %v1758_v43 }
 0x6bf   : > { %v1760_v6 = vmul.f32 %v3521_v40, %v1759_v44 }
 0x6c1   : > { %v1764_v47 = vsel %vm1763_vm14, %v3521_v40, %v1760_v6 }
 0x6c2   : > { %v1766_v49 = vmul.f32 %v1765_v45, %v1764_v47 }
 0x6c4   : > { %v1770_v50 = vmul.f32 %v3506_v46, %v1766_v49  ;;  %1779 = sbr.rel (%p2928_p5) target bundleno = 2489 (0x9b9), region = 156 }
 0x6c6   : > { %v1774_v51 = vadd.f32 %v3507_v48, %v1770_v50 }
 0x6c8   : > { %1775 = vst [vmem:[#allocation2] sm:$0xff] %v1774_v51 }
 0x6c9   : > { %v3277_v52 = vld [vmem:[#allocation9 + $0x38] sm:$0xff]  ;;  %v3276_v53 = vld [vmem:[#allocation9 + $0x30] sm:$0xff]  ;;  %v3275_v54 = vld [vmem:[#allocation9 + $0x28] sm:$0xff]  ;;  %v1796_v60 = vpack.c.bf16 %v1774_v51, %v1774_v51  ;;  %vm1870_vm15 = vcmask 1040384  }
 0x6ca   : > { %1846 = vmatpush.bf16.msra.mxu0 %v3277_v52  ;;  %v3274_v55 = vld [vmem:[#allocation9 + $0x20] sm:$0xff]  ;;  %v3273_v56 = vld [vmem:[#allocation9 + $0x18] sm:$0xff]  ;;  %v3272_v57 = vld [vmem:[#allocation9 + $0x10] sm:$0xff] }
 0x6cb   : > { %v3271_v58 = vld [vmem:[#allocation9 + $0x8] sm:$0xff]  ;;  %v3270_v59 = vld [vmem:[#allocation9] sm:$0xff]  ;;  %v1797_v61 = vld [vmem:[%s4823_s14] sm:$0x1] }
 0x6cc   : > { %v3019_v15 = vld [vmem:[#allocation11 + $0x70] sm:$0xf]  ;;  %v3293_v16 = vld [vmem:[#allocation11 + $0x74] sm:$0xf0]  ;;  %v3292_v11 = vld [vmem:[#allocation11 + $0x74] sm:$0xf] }
 0x6cd   : > { %v3020_v17 = vor.u32 %v3293_v16, %v3019_v15  ;;  %v3021_v20 = vld [vmem:[#allocation11 + $0x78] sm:$0xf0]  ;;  %v3011_v22 = vld [vmem:[#allocation11 + $0x60] sm:$0xf]  ;;  %v3291_v23 = vld [vmem:[#allocation11 + $0x64] sm:$0xf0] }
 0x6ce   : > { %1847 = vmatpush.bf16.msra.mxu0 %v3276_v53  ;;  %v3024_v21 = vor.u32 %v3292_v11, %v3021_v20  ;;  %v3290_v24 = vld [vmem:[#allocation11 + $0x64] sm:$0xf]  ;;  %v3012_v25 = vor.u32 %v3291_v23, %v3011_v22  ;;  %v3013_v26 = vld [vmem:[#allocation11 + $0x68] sm:$0xf0]  ;;  %v3003_v28 = vld [vmem:[#allocation11 + $0x50] sm:$0xf] }
 0x6cf   : > { %2001 = vmatpush.bf16.msra.mxu1 %v3020_v17  ;;  %v3016_v27 = vor.u32 %v3290_v24, %v3013_v26  ;;  %v3289_v29 = vld [vmem:[#allocation11 + $0x54] sm:$0xf0]  ;;  %v3288_v30 = vld [vmem:[#allocation11 + $0x54] sm:$0xf]  ;;  %v3005_v32 = vld [vmem:[#allocation11 + $0x58] sm:$0xf0] }
 0x6d0   : > { %2014 = vmatpush.bf16.msra.mxu2 %v3024_v21  ;;  %v3004_v31 = vor.u32 %v3289_v29, %v3003_v28  ;;  %v3008_v33 = vor.u32 %v3288_v30, %v3005_v32  ;;  %v2995_v34 = vld [vmem:[#allocation11 + $0x40] sm:$0xf]  ;;  %v3287_v35 = vld [vmem:[#allocation11 + $0x44] sm:$0xf0]  ;;  %v3286_v36 = vld [vmem:[#allocation11 + $0x44] sm:$0xf] }
 0x6d1   : > { %v2996_v37 = vor.u32 %v3287_v35, %v2995_v34  ;;  %v2997_v18 = vld [vmem:[#allocation11 + $0x48] sm:$0xf0]  ;;  %v2987_v38 = vld [vmem:[#allocation11 + $0x30] sm:$0xf]  ;;  %v3285_v39 = vld [vmem:[#allocation11 + $0x34] sm:$0xf0] }
 0x6d2   : > { %1848 = vmatpush.bf16.msra.mxu0 %v3275_v54  ;;  %v3000_v19 = vor.u32 %v3286_v36, %v2997_v18  ;;  %v3284_v40 = vld [vmem:[#allocation11 + $0x34] sm:$0xf]  ;;  %v2988_v41 = vor.u32 %v3285_v39, %v2987_v38  ;;  %v2989_v42 = vld [vmem:[#allocation11 + $0x38] sm:$0xf0]  ;;  %v2979_v44 = vld [vmem:[#allocation11 + $0x20] sm:$0xf] }
 0x6d3   : > { %2002 = vmatpush.bf16.msra.mxu1 %v3012_v25  ;;  %v2992_v43 = vor.u32 %v3284_v40, %v2989_v42  ;;  %v3283_v6 = vld [vmem:[#allocation11 + $0x24] sm:$0xf0]  ;;  %v3282_v45 = vld [vmem:[#allocation11 + $0x24] sm:$0xf]  ;;  %v2981_v47 = vld [vmem:[#allocation11 + $0x28] sm:$0xf0] }
 0x6d4   : > { %2015 = vmatpush.bf16.msra.mxu2 %v3016_v27  ;;  %v2980_v46 = vor.u32 %v3283_v6, %v2979_v44  ;;  %v2971_v48 = vld [vmem:[#allocation11 + $0x10] sm:$0xf]  ;;  %v3281_v49 = vld [vmem:[#allocation11 + $0x14] sm:$0xf0]  ;;  %v2984_v50 = vor.u32 %v3282_v45, %v2981_v47  ;;  %v3280_v51 = vld [vmem:[#allocation11 + $0x14] sm:$0xf] }
 0x6d5   : > { %v2973_v52 = vld [vmem:[#allocation11 + $0x18] sm:$0xf0]  ;;  %v2972_v54 = vor.u32 %v3281_v49, %v2971_v48  ;;  %v3077_v16 = vld [vmem:[%s4825_s22 + $0x68] sm:$0xf0]  ;;  %v3147_v17 = vld [vmem:[%s4825_s22 + $0xf0] sm:$0xf] }
 0x6d6   : > { %1849 = vmatpush.bf16.msra.mxu0 %v3274_v55  ;;  %v2976_v55 = vor.u32 %v3280_v51, %v2973_v52  ;;  %v3306_v15 = vld [vmem:[%s4825_s22 + $0x64] sm:$0xf]  ;;  %v3325_v20 = vld [vmem:[%s4825_s22 + $0xf4] sm:$0xf0]  ;;  %v3324_v21 = vld [vmem:[%s4825_s22 + $0xf4] sm:$0xf] }
 0x6d7   : > { %2003 = vmatpush.bf16.msra.mxu1 %v3004_v31  ;;  %v3080_v23 = vor.u32 %v3306_v15, %v3077_v16  ;;  %v3148_v24 = vor.u32 %v3325_v20, %v3147_v17  ;;  %v3149_v25 = vld [vmem:[%s4825_s22 + $0xf8] sm:$0xf0]  ;;  %v3067_v26 = vld [vmem:[%s4825_s22 + $0x50] sm:$0xf]  ;;  %v3305_v28 = vld [vmem:[%s4825_s22 + $0x54] sm:$0xf0] }
 0x6d8   : > { %2016 = vmatpush.bf16.msra.mxu2 %v3008_v33  ;;  %v3152_v27 = vor.u32 %v3324_v21, %v3149_v25  ;;  %v3304_v29 = vld [vmem:[%s4825_s22 + $0x54] sm:$0xf]  ;;  %v3069_v30 = vld [vmem:[%s4825_s22 + $0x58] sm:$0xf0]  ;;  %v3139_v31 = vld [vmem:[%s4825_s22 + $0xe0] sm:$0xf]  ;;  %v3068_v34 = vor.u32 %v3305_v28, %v3067_v26 }
 0x6d9   : > { %v3323_v32 = vld [vmem:[%s4825_s22 + $0xe4] sm:$0xf0]  ;;  %v3322_v33 = vld [vmem:[%s4825_s22 + $0xe4] sm:$0xf]  ;;  %v3141_v36 = vld [vmem:[%s4825_s22 + $0xe8] sm:$0xf0] }
 0x6da   : > { %1850 = vmatpush.bf16.msra.mxu0 %v3273_v56  ;;  %v2963_v56 = vld [vmem:[#allocation11] sm:$0xf]  ;;  %v3140_v35 = vor.u32 %v3323_v32, %v3139_v31  ;;  %v3144_v38 = vor.u32 %v3322_v33, %v3141_v36  ;;  %v3302_v39 = vld [vmem:[%s4825_s22 + $0x44] sm:$0xf]  ;;  %v3061_v40 = vld [vmem:[%s4825_s22 + $0x48] sm:$0xf0] }
 0x6db   : > { %2004 = vmatpush.bf16.msra.mxu1 %v2996_v37  ;;  %v3059_v37 = vld [vmem:[%s4825_s22 + $0x40] sm:$0xf]  ;;  %v3303_v18 = vld [vmem:[%s4825_s22 + $0x44] sm:$0xf0]  ;;  %v3321_v42 = vld [vmem:[%s4825_s22 + $0xd4] sm:$0xf0]  ;;  %v3064_v51 = vor.u32 %v3302_v39, %v3061_v40 }
 0x6dc   : > { %2017 = vmatpush.bf16.msra.mxu2 %v3000_v19  ;;  %v3072_v19 = vor.u32 %v3304_v29, %v3069_v30  ;;  %v3133_v44 = vld [vmem:[%s4825_s22 + $0xd8] sm:$0xf0]  ;;  %v3060_v45 = vor.u32 %v3303_v18, %v3059_v37  ;;  %v3051_v47 = vld [vmem:[%s4825_s22 + $0x30] sm:$0xf]  ;;  %v3123_v48 = vld [vmem:[%s4825_s22 + $0xc0] sm:$0xf] }
 0x6dd   : > { %v3319_v49 = vld [vmem:[%s4825_s22 + $0xc4] sm:$0xf0]  ;;  %v3301_v52 = vld [vmem:[%s4825_s22 + $0x34] sm:$0xf0]  ;;  %v3296_v21 = vld [vmem:[%s4825_s22 + $0x14] sm:$0xf] }
 0x6de   : > { %1851 = vmatpush.bf16.msra.mxu0 %v3272_v57  ;;  %v3279_v57 = vld [vmem:[#allocation11 + $0x4] sm:$0xf0]  ;;  %v3297_v17 = vld [vmem:[%s4825_s22 + $0x14] sm:$0xf0]  ;;  %v1868_v25 = vld [vmem:[%s4826_s10] sm:$0x1] }
 0x6df   : > { %2005 = vmatpush.bf16.msra.mxu1 %v2988_v41  ;;  %v3131_v41 = vld [vmem:[%s4825_s22 + $0xd0] sm:$0xf]  ;;  %v1869_v29 = vld [vmem:[%s4827_s19] sm:$0x1]  ;;  %v3315_v32 = vld [vmem:[%s4825_s22 + $0xa4] sm:$0xf0] }
 0x6e0   : > { %2018 = vmatpush.bf16.msra.mxu2 %v2992_v43  ;;  %v3320_v43 = vld [vmem:[%s4825_s22 + $0xd4] sm:$0xf]  ;;  %v3132_v6 = vor.u32 %v3321_v42, %v3131_v41  ;;  %v3107_v31 = vld [vmem:[%s4825_s22 + $0xa0] sm:$0xf]  ;;  %v3314_v33 = vld [vmem:[%s4825_s22 + $0xa4] sm:$0xf] }
 0x6e1   : > { %v3027_v37 = vld [vmem:[%s4825_s22] sm:$0xf]  ;;  %v3295_v18 = vld [vmem:[%s4825_s22 + $0x4] sm:$0xf0]  ;;  %v3029_v39 = vld [vmem:[%s4825_s22 + $0x8] sm:$0xf0] }
 0x6e2   : > { %1852 = vmatpush.bf16.msra.mxu0 %v3271_v58  ;;  %v3278_v58 = vld [vmem:[#allocation11 + $0x4] sm:$0xf]  ;;  %v3099_v41 = vld [vmem:[%s4825_s22 + $0x90] sm:$0xf]  ;;  %v3313_v42 = vld [vmem:[%s4825_s22 + $0x94] sm:$0xf0] }
 0x6e3   : > { %2006 = vmatpush.bf16.msra.mxu1 %v2980_v46  ;;  %v3136_v46 = vor.u32 %v3320_v43, %v3133_v44  ;;  %v3312_v43 = vld [vmem:[%s4825_s22 + $0x94] sm:$0xf]  ;;  %v3100_v44 = vor.u32 %v3313_v42, %v3099_v41 }
 0x6e4   : > { %2019 = vmatpush.bf16.msra.mxu2 %v2984_v50 }
 0x6e6   : > { %1853 = vmatpush.bf16.msra.mxu0 %v3270_v59  ;;  %v2965_v59 = vld [vmem:[#allocation11 + $0x8] sm:$0xf0] }
 0x6e7   : > { %2007 = vmatpush.bf16.msra.mxu1 %v2972_v54  ;;  %v3125_v54 = vld [vmem:[%s4825_s22 + $0xc8] sm:$0xf0] }
 0x6e8   : > { %2020 = vmatpush.bf16.msra.mxu2 %v2976_v55 }
 0x6e9   : > { %1854 = vmatmul.bf16.vlgmr.msra.gmra.mxu0 %v1796_v60  ;;  %v2964_v60 = vor.u32 %v3279_v57, %v2963_v56  ;;  %v3300_v56 = vld [vmem:[%s4825_s22 + $0x34] sm:$0xf]  ;;  %v3053_v57 = vld [vmem:[%s4825_s22 + $0x38] sm:$0xf0] }
 0x6ea   : > { %2240 = vmatpush.bf16.msrb.mxu0 %v3148_v24 }
 0x6eb   : > { %2008 = vmatpush.bf16.msra.mxu1 %v2964_v60  ;;  %v3052_v60 = vor.u32 %v3301_v52, %v3051_v47  ;;  %v3311_v47 = vld [vmem:[%s4825_s22 + $0x84] sm:$0xf0]  ;;  %v3333_v52 = vld [vmem:[#allocation12 + $0x38] sm:$0xff] }
 0x6ee   : > { %2241 = vmatpush.bf16.msrb.mxu0 %v3140_v35  ;;  %v3109_v35 = vld [vmem:[%s4825_s22 + $0xa8] sm:$0xf0] }
 0x6ef   : > { %v3112_v36 = vor.u32 %v3314_v33, %v3109_v35 }
 0x6f2   : > { %2242 = vmatpush.bf16.msrb.mxu0 %v3132_v6  ;;  %v3101_v6 = vld [vmem:[%s4825_s22 + $0x98] sm:$0xf0] }
 0x766   : > { %v1855_v62 = vpop.f32.mrf.mxu0 }
 0x767   : > { %v1856_v63 = vadd.f32 %v1855_v62, %v1797_v61  ;;  %v2968_v62 = vor.u32 %v3278_v58, %v2965_v59  ;;  %v3124_v58 = vor.u32 %v3319_v49, %v3123_v48  ;;  %v3310_v49 = vld [vmem:[%s4825_s22 + $0x84] sm:$0xf] }
 0x769   : > { %v1859_v0 = vmul.f32 %v1856_v63, %v1856_v63  ;;  %2021 = vmatpush.bf16.msra.mxu2 %v2968_v62  ;;  %2243 = vmatpush.bf16.msrb.mxu0 %v3124_v58  ;;  %v3330_v58 = vld [vmem:[#allocation12 + $0x20] sm:$0xff] }
 0x76b   : > { %v1860_v1 = vmul.f32 %v1859_v0, %v1856_v63 }
 0x76d   : > { %v1861_v2 = vmul.f32 0.044715, %v1860_v1  ;;  %2266 = vmatpush.bf16.msrb.mxu2 %v3152_v27 }
 0x76e   : > { %v1857_v3 = vpop.f32.mrf.mxu0 }
 0x76f   : > { %v1862_v4 = vadd.f32 %v1861_v2, %v1856_v63  ;;  %v3083_v3 = vld [vmem:[%s4824_s27 + $0x70] sm:$0xf] }
 0x771   : > { %v1863_v5 = vmul.f32 0.7978846, %v1862_v4  ;;  %v3309_v4 = vld [vmem:[%s4825_s22 + $0x74] sm:$0xf0]  ;;  %2267 = vmatpush.bf16.msrb.mxu2 %v3144_v38  ;;  %v3028_v38 = vor.u32 %v3295_v18, %v3027_v37  ;;  %v2315_v18 = vld [vmem:[%s4830_s12] sm:$0x1] }
 0x773   : > { %3522 = vtanh.f32 %v1863_v5  ;;  %v3308_v5 = vld [vmem:[%s4825_s22 + $0x74] sm:$0xf] }
 0x775   : > { %2268 = vmatpush.bf16.msrb.mxu2 %v3136_v46  ;;  %v3091_v46 = vld [vmem:[%s4825_s22 + $0x80] sm:$0xf] }
 0x776   : > { %v3092_v48 = vor.u32 %v3311_v47, %v3091_v46 }
 0x779   : > { %v3523_v7 = vpop.eup %3522 }
 0x77a   : > { %v1865_v8 = vadd.f32 1.0, %v3523_v7  ;;  %v3084_v7 = vor.u32 %v3309_v4, %v3083_v3  ;;  %v3299_v3 = vld [vmem:[%s4825_s22 + $0x24] sm:$0xf0]  ;;  %v3316_v4 = vld [vmem:[%s4825_s22 + $0xb4] sm:$0xf] }
 0x77c   : > { %v1866_v9 = vmul.f32 0.5, %v1865_v8  ;;  %v3085_v8 = vld [vmem:[%s4825_s22 + $0x78] sm:$0xf0]  ;;  %2227 = vmatpush.bf16.msra.mxu3 %v3084_v7 }
 0x77e   : > { %v4405_v10 = vmul.f32 %v1866_v9, %v1856_v63  ;;  %v3075_v9 = vld [vmem:[%s4825_s22 + $0x60] sm:$0xf] }
 0x780   : > { %v1871_v12 = vsel %vm1870_vm15, %v4405_v10, 0.0  ;;  %v1875_v13 = vmul.f32 %v4405_v10, %v4405_v10 }
 0x781   : > { %1872 = vadd.xlane.f32.xlu0 %v1871_v12  ;;  %v3307_v12 = vld [vmem:[%s4825_s22 + $0x64] sm:$0xf0] }
 0x782   : > { %v1876_v14 = vsel %vm1870_vm15, %v1875_v13, 0.0  ;;  %v3076_v11 = vor.u32 %v3307_v12, %v3075_v9  ;;  %v3045_v9 = vld [vmem:[%s4825_s22 + $0x28] sm:$0xf0] }
 0x784   : > { %2228 = vmatpush.bf16.msra.mxu3 %v3076_v11  ;;  %v3035_v11 = vld [vmem:[%s4825_s22 + $0x10] sm:$0xf] }
 0x788   : > { %2229 = vmatpush.bf16.msra.mxu3 %v3068_v34  ;;  %v3108_v34 = vor.u32 %v3315_v32, %v3107_v31 }
 0x789   : > { %1877 = vadd.xlane.f32.xlu0 %v1876_v14  ;;  %v3088_v14 = vor.u32 %v3308_v5, %v3085_v8  ;;  %v3117_v5 = vld [vmem:[%s4825_s22 + $0xb8] sm:$0xf0]  ;;  %v3298_v8 = vld [vmem:[%s4825_s22 + $0x24] sm:$0xf] }
 0x78a   : > { %v3120_v15 = vor.u32 %v3316_v4, %v3117_v5  ;;  %v3048_v16 = vor.u32 %v3298_v8, %v3045_v9  ;;  %v3329_v8 = vld [vmem:[#allocation12 + $0x18] sm:$0xff]  ;;  %v3338_v9 = vld [vmem:[#allocation12 + $0x60] sm:$0xff] }
 0x78b   : > { %2253 = vmatpush.bf16.msrb.mxu1 %v3088_v14 }
 0x78c   : > { %2230 = vmatpush.bf16.msra.mxu3 %v3060_v45  ;;  %v3104_v45 = vor.u32 %v3312_v43, %v3101_v6 }
 0x78f   : > { %2254 = vmatpush.bf16.msrb.mxu1 %v3080_v23  ;;  %v3037_v23 = vld [vmem:[%s4825_s22 + $0x18] sm:$0xf0] }
 0x790   : > { %2231 = vmatpush.bf16.msra.mxu3 %v3052_v60  ;;  %v3040_v28 = vor.u32 %v3296_v21, %v3037_v23  ;;  %v2061_v21 = vld [vmem:[%s4829_s25] sm:$0x3] }
 0x791   : > { %v2223_v23 = vperm.slane %v2061_v21, 0 }
 0x793   : > { %2255 = vmatpush.bf16.msrb.mxu1 %v3072_v19  ;;  %v3294_v19 = vld [vmem:[%s4825_s22 + $0x4] sm:$0xf] }
 0x794   : > { %v3032_v40 = vor.u32 %v3294_v19, %v3029_v39 }
 0x797   : > { %2256 = vmatpush.bf16.msrb.mxu1 %v3064_v51 }
 0x7f4   : > { %v1873_v53 = vpop.xlane.xlu0 %1872 }
 0x7f5   : > { %v4410_v61 = vmul.f32 0.03125, %v1873_v53  ;;  %v3318_v53 = vld [vmem:[%s4825_s22 + $0xc4] sm:$0xf] }
 0x7f6   : > { %v3128_v62 = vor.u32 %v3318_v53, %v3125_v54  ;;  %v3341_v53 = vld [vmem:[#allocation12 + $0x78] sm:$0xff]  ;;  %v3332_v54 = vld [vmem:[#allocation12 + $0x30] sm:$0xff] }
 0x7f7   : > { %v1880_v0 = vmul.f32 %v4410_v61, %v4410_v61  ;;  %v1894_v24 = vsub.f32 %v4405_v10, %v4410_v61 }
 0x7f8   : > { %2269 = vmatpush.bf16.msrb.mxu2 %v3128_v62 }
 0x7fc   : > { %v1878_v63 = vpop.xlane.xlu0 %1877  ;;  %2270 = vmatpush.bf16.msrb.mxu2 %v3120_v15  ;;  %v3336_v15 = vld [vmem:[#allocation12 + $0x50] sm:$0xff] }
 0x7fd   : > { %v1879_v1 = vmul.f32 0.03125, %v1878_v63  ;;  %v3043_v63 = vld [vmem:[%s4825_s22 + $0x20] sm:$0xf] }
 0x7fe   : > { %v3044_v14 = vor.u32 %v3299_v3, %v3043_v63 }
 0x7ff   : > { %v1881_v2 = vsub.f32 %v1879_v1, %v1880_v0  ;;  %v3115_v0 = vld [vmem:[%s4825_s22 + $0xb0] sm:$0xf]  ;;  %v3317_v1 = vld [vmem:[%s4825_s22 + $0xb4] sm:$0xf0] }
 0x800   : > { %v3116_v12 = vor.u32 %v3317_v1, %v3115_v0  ;;  %2232 = vmatpush.bf16.msra.mxu3 %v3044_v14  ;;  %2271 = vmatpush.bf16.msrb.mxu2 %v3112_v36  ;;  %v3327_v14 = vld [vmem:[#allocation12 + $0x8] sm:$0xff] }
 0x801   : > { %v1882_v13 = vmax.f32 %v1881_v2, 0.0  ;;  %v3056_v2 = vor.u32 %v3300_v56, %v3053_v57  ;;  %v3331_v56 = vld [vmem:[#allocation12 + $0x28] sm:$0xff] }
 0x802   : > { %2244 = vmatpush.bf16.msrb.mxu0 %v3116_v12  ;;  %v3339_v57 = vld [vmem:[#allocation12 + $0x68] sm:$0xff]  ;;  %v3328_v12 = vld [vmem:[#allocation12 + $0x10] sm:$0xff] }
 0x803   : > { %v4447_v22 = vadd.f32 1e-12, %v1882_v13  ;;  %2257 = vmatpush.bf16.msrb.mxu1 %v3056_v2 }
 0x804   : > { %2272 = vmatpush.bf16.msrb.mxu2 %v3104_v45 }
 0x805   : > { %3524 = vrsqrt.f32 %v4447_v22  ;;  %vm1890_vm1 = vweird.f32 %v4447_v22 }
 0x806   : > { %2245 = vmatpush.bf16.msrb.mxu0 %v3108_v34 }
 0x807   : > { %2258 = vmatpush.bf16.msrb.mxu1 %v3048_v16  ;;  %v3326_v16 = vld [vmem:[#allocation12] sm:$0xff] }
 0x80a   : > { %2246 = vmatpush.bf16.msrb.mxu0 %v3100_v44 }
 0x80b   : > { %v3525_v50 = vpop.eup %3524  ;;  %2259 = vmatpush.bf16.msrb.mxu1 %v3040_v28 }
 0x80c   : > { %v1885_v55 = vmul.f32 %v3525_v50, %v4447_v22  ;;  %vm1891_vm0 = vweird.f32 %v3525_v50  ;;  %v3036_v22 = vor.u32 %v3297_v17, %v3035_v11  ;;  %v3335_v11 = vld [vmem:[#allocation12 + $0x48] sm:$0xff]  ;;  %v3334_v17 = vld [vmem:[#allocation12 + $0x40] sm:$0xff] }
 0x80d   : > { %vm1892_vm2 = vmor %vm1890_vm1, %vm1891_vm0 }
 0x80e   : > { %v1886_v59 = vmul.f32 %v3525_v50, %v1885_v55  ;;  %2233 = vmatpush.bf16.msra.mxu3 %v3036_v22  ;;  %2247 = vmatpush.bf16.msrb.mxu0 %v3092_v48  ;;  %v3340_v55 = vld [vmem:[#allocation12 + $0x70] sm:$0xff] }
 0x80f   : > { %2260 = vmatpush.bf16.msrb.mxu1 %v3032_v40 }
 0x810   : > { %v1887_v7 = vmul.f32 0.5, %v1886_v59  ;;  %v1915_v59 = vld [vmem:[%s4828_s15] sm:$0x3] }
 0x811   : > { %v1997_v60 = vperm.slane %v1915_v59, 0  ;;  %v1998_v1 = vperm.slane %v1915_v59, 1 }
 0x812   : > { %v1888_v13 = vsub.f32 1.5, %v1887_v7  ;;  %2234 = vmatpush.bf16.msra.mxu3 %v3028_v38  ;;  %2425 = vmatpush.bf16.msra.mxu0 %v3341_v53 }
 0x814   : > { %v1889_v20 = vmul.f32 %v3525_v50, %v1888_v13  ;;  %v3337_v13 = vld [vmem:[#allocation12 + $0x58] sm:$0xff] }
 0x816   : > { %v1893_v26 = vsel %vm1892_vm2, %v3525_v50, %v1889_v20  ;;  %v3093_v50 = vld [vmem:[%s4825_s22 + $0x88] sm:$0xf0]  ;;  %2412 = vmatpush.bf16.msrb.mxu3 %v3333_v52  ;;  %2426 = vmatpush.bf16.msra.mxu0 %v3340_v55 }
 0x817   : > { %v1895_v27 = vmul.f32 %v1894_v24, %v1893_v26  ;;  %v3096_v51 = vor.u32 %v3310_v49, %v3093_v50  ;;  %v2224_v26 = vperm.slane %v2061_v21, 1 }
 0x819   : > { %v1896_v30 = vmul.f32 %v1895_v27, %v1868_v25  ;;  %2273 = vmatpush.bf16.msrb.mxu2 %v3096_v51 }
 0x81a   : > { %2413 = vmatpush.bf16.msrb.mxu3 %v3332_v54  ;;  %2427 = vmatpush.bf16.msra.mxu0 %v3339_v57 }
 0x81b   : > { %v1897_v10 = vadd.f32 %v1896_v30, %v1869_v29 }
 0x81d   : > { %v1914_v61 = vpack.c.bf16 %v1897_v10, %v1897_v10 }
 0x81e   : > { %2414 = vmatpush.bf16.msrb.mxu3 %v3331_v56  ;;  %2428 = vmatpush.bf16.msra.mxu0 %v3338_v9 }
 0x81f   : > { %2009 = vmatmul.bf16.vlgmr.msra.gmra.mxu1 %v1914_v61  ;;  %2022 = vmatmul.bf16.vlgmr.msra.gmra.mxu2 %v1914_v61 }
 0x822   : > { %2415 = vmatpush.bf16.msrb.mxu3 %v3330_v58  ;;  %2429 = vmatpush.bf16.msra.mxu0 %v3337_v13 }
 0x826   : > { %2416 = vmatpush.bf16.msrb.mxu3 %v3329_v8  ;;  %2430 = vmatpush.bf16.msra.mxu0 %v3336_v15 }
 0x82a   : > { %2417 = vmatpush.bf16.msrb.mxu3 %v3328_v12  ;;  %2431 = vmatpush.bf16.msra.mxu0 %v3335_v11 }
 0x82e   : > { %2418 = vmatpush.bf16.msrb.mxu3 %v3327_v14  ;;  %2432 = vmatpush.bf16.msra.mxu0 %v3334_v17 }
 0x832   : > { %2419 = vmatpush.bf16.msrb.mxu3 %v3326_v16 }
 0x89c   : > { %v2010_v62 = vpop.f32.mrf.mxu1 }
 0x89d   : > { %v2011_v63 = vadd.f32 %v2010_v62, %v1997_v60 }
 0x89f   : > { %v2059_v0 = vpack.c.bf16 %v2011_v63, %v2011_v63 }
 0x8a1   : > { %2235 = vmatmul.bf16.vlgmr.msra.gmra.mxu3 %v2059_v0  ;;  %2261 = vmatmul.bf16.vlgmr.msrb.gmra.mxu1 %v2059_v0 }
 0x8a2   : > { %v2023_v2 = vpop.f32.mrf.mxu2 }
 0x8a3   : > { %v2024_v3 = vadd.f32 %v2023_v2, %v1998_v1 }
 0x8a4   : > { %v2012_v4 = vpop.f32.mrf.mxu1 }
 0x8a5   : > { %v2060_v5 = vpack.c.bf16 %v2024_v3, %v2024_v3 }
 0x8a7   : > { %2248 = vmatmul.bf16.vlgmr.msrb.gmra.mxu0 %v2060_v5  ;;  %2274 = vmatmul.bf16.vlgmr.msrb.gmra.mxu2 %v2060_v5 }
 0x8aa   : > { %v2025_v7 = vpop.f32.mrf.mxu2 }
 0x91e   : > { %v2262_v20 = vpop.f32.mrf.mxu1 }
 0x91f   : > { %v2263_v29 = vadd.f32 %v2262_v20, %v2224_v26 }
 0x924   : > { %v2236_v24 = vpop.f32.mrf.mxu3  ;;  %v2249_v25 = vpop.f32.mrf.mxu0 }
 0x925   : > { %v2237_v22 = vadd.f32 %v2236_v24, %v2223_v23 }
 0x926   : > { %v2264_v27 = vpop.f32.mrf.mxu1 }
 0x927   : > { %v2250_v28 = vadd.f32 %v2249_v25, %v2237_v22 }
 0x929   : > { %v2279_v30 = vmax.f32 %v2250_v28, 0.0 }
 0x92a   : > { %v2275_v10 = vpop.f32.mrf.mxu2 }
 0x92b   : > { %v2313_v61 = vpack.c.bf16 %v2279_v30, %v2279_v30  ;;  %v2276_v31 = vadd.f32 %v2275_v10, %v2263_v29 }
 0x92c   : > { %v2238_v32 = vpop.f32.mrf.mxu3  ;;  %v2251_v33 = vpop.f32.mrf.mxu0 }
 0x92d   : > { %v2280_v34 = vmax.f32 %v2276_v31, 0.0  ;;  %2420 = vmatmul.bf16.vlgmr.msrb.gmra.mxu3 %v2313_v61 }
 0x92f   : > { %v2314_v35 = vpack.c.bf16 %v2280_v34, %v2280_v34 }
 0x931   : > { %2433 = vmatmul.bf16.vlgmr.msra.gmra.mxu0 %v2314_v35 }
 0x932   : > { %v2277_v36 = vpop.f32.mrf.mxu2 }
 0x9ae   : > { %v2434_v37 = vpop.f32.mrf.mxu0 }
 0x9b0   : > { %v2421_v19 = vpop.f32.mrf.mxu3 }
 0x9b1   : > { %v2422_v38 = vadd.f32 %v2421_v19, %v2315_v18 }
 0x9b3   : > { %v2435_v39 = vadd.f32 %v2434_v37, %v2422_v38 }
 0x9b5   : > { %2438 = vst [vmem:[%s4251_s5] sm:$0x1] %v2435_v39 }
 0x9b6   : > { %v2436_v40 = vpop.f32.mrf.mxu0 }
 0x9b8   : > { %v2423_v41 = vpop.f32.mrf.mxu3 }
 0x9b9 PF: > { %s4831_s21 = sld [smem:[#allocation25_spill]]  ;;  %s2450_s18 = sshll.u32 %s4251_s5, 4  ;;  %s2451_s18 = int_to_ptr.vmem [resolvable:$true] %s2450_s18 }
 0x9ba   : > { %s4832_s16 = sld [smem:[#allocation62_spill]]  ;;  %s4834_s8 = sand.u32 1, %s3804_s3  }
 0x9bb   : > { %s2440_s26 = scalar_lea.sflag [#allocation5], %s4834_s8 }
 0x9c0   : > { %s2448_s24 = scalar_lea.hbm %s4832_s16, %s4831_s21  ;;  %s3726_s19 = scalar_lea.hbm %s4832_s16, 2 }
 0x9c1   : > { %s2452_s29 = sshll.u32 %s2448_s24, 4  ;;  %s2453_s29 = int_to_ptr.hbm [resolvable:$true] %s2452_s29 }
 0x9c2   : > { %s3720_s0 = sshra.s32 %s2453_s29, 4  ;;  %s3721_s0 = int_to_ptr.hbm [resolvable:$true] %s3720_s0 }
 0x9c3   : > { %s3722_s10 = scalar_lea.hbm %s3721_s0, 1  ;;  %p3727_p12 = scmp.lt.s32.totalorder %s3721_s0, %s4832_s16 }
 0x9c4   : > { %p3723_p6 = scmp.ne.s32.totalorder %s3721_s0, %s3722_s10  ;;  %p3728_p1 = scmp.lt.s32.totalorder %s3726_s19, %s3722_s10 }
 0x9c6   : > { %p3724_p8 = pnand %p3723_p6, %p4058_p7  ;;  %p3729_p11 = por %p3728_p1, %p3727_p12 }
 0x9c8   : > { %p3725_p10 = pneg %p3724_p8 }
 0x9ca   : > { %p3730_p13 = pnand %p3729_p11, %p3725_p10 }
 0x9cc   : > { %3733 = shalt.err (!%p3730_p13)
}
 0x9cd   : > { %3364 = dma.vmem_to_hbm [thread:$0]  (%p4058_p7), %s2451_s18, 16, %s2453_s29, %s2440_s26  }
 0x9ce PF: > { %s4835_s5 = sld [smem:[#allocation28_spill]] }
 0x9cf   : > { %s4836_s23 = sld [smem:[#allocation20_spill]] }
 0x9d4   : > { %p3397_p0 = scmp.ge.s32.totalorder %s4835_s5, 2 }
 0x9d5   : > { %s2464_s4 = sand.u32 1, %s4836_s23  }
 0x9d6   : > { %p3387_p3 = pnand %p3397_p0, %p4063_p9  ;;  %s2465_s7 = scalar_lea.sflag [#allocation5], %s2464_s4 }
 0x9d8   : > { %p3388_p2 = pneg %p3387_p3 }
 0x9da   : > { %3795 = dma.done.wait (%p3388_p2), %s2465_s7, 16  }
 0x9db   : > { %3797 = vsyncadd (%p3388_p2), %s2465_s7, 4294967280  ;;  %s47_s2 = sadd.s32 1, %s4835_s5   ;;  %s4838_s15 = sld [smem:[#allocation21_spill]] }
 0x9dc   : > { %p44_p4 = scmp.ge.s32.totalorder %s47_s2, 6   ;;  %s4839_s7 = sld [smem:[#allocation34_spill]] }
 0x9dd   : > { %s4840_s28 = sld [smem:[#allocation22_spill]]  ;;  %s4847_s27 = smov %s3804_s3 }
 0x9de   : > { %s4841_s8 = sld [smem:[#allocation23_spill]] }
 0x9df   : > { %s4842_s4 = sld [smem:[#allocation33_spill]]  ;;  %46 = sbr.rel (!%p44_p4) target bundleno = 41 (0x29), region = 246 }
 0x9e0   : > { %s4843_s29 = sld [smem:[#allocation26_spill]] }
 0x9e1   : > { %s4844_s0 = sld [smem:[#allocation27_spill]]  ;;  %s4848_s3 = smov %s4838_s15 }
 0x9e2   : > { %s4845_s9 = sld [smem:[#allocation31_spill]] }
 0x9e3   : > { %s4846_s30 = sld [smem:[#allocation32_spill]] }
 0x9e4   :  { %2470 = vsyncpa [#allocation4], 1 }
 0x9e5   :  { %2472 = vsyncpa [#allocation4 + $0x1], 1 }
 0x9e6   :  { %2473 = vsyncpa [#allocation7], 1 }
 0x9e7   :  { %2475 = vsyncpa [#allocation7 + $0x1], 1 }
 0x9e8   :  { %2476 = vsyncpa [#allocation10], 1 }
 0x9e9   :  { %2477 = vsyncpa [#allocation13], 1 }
 0x9ea   :  { %2478 = vsyncpa [#allocation5], 1 }
 0x9eb   :  { %2480 = vsyncpa [#allocation5 + $0x1], 1 }

</bundles_post_ra>
